<compile_context>
chip_gen: v7x
topology: tpu7x:2x2x1
jax: 0.10.0
libtpu: 0.0.40
codegen_flags: <defaults>
</compile_context>

<pallas_src>
import math
import functools

import jax
import jax.numpy as jnp
from jax.experimental import pallas as pl
from jax.experimental.pallas import tpu as pltpu


def _block_kernel(x_ref,
                  g1_ref, b1_ref,
                  wqkv_ref,
                  wproj_ref, bproj_ref,
                  g2_ref, b2_ref,
                  wfc1_ref, bfc1_ref,
                  wfc2_ref, bfc2_ref,
                  o_ref,
                  attn_scratch,
                  *, num_heads, scale, eps):
    x = x_ref[0].astype(jnp.float32)            # (N, C) f32
    N, C = x.shape
    hd = C // num_heads

    def layernorm(v, g, b):
        mu = jnp.mean(v, axis=-1, keepdims=True)
        d = v - mu
        var = jnp.mean(d * d, axis=-1, keepdims=True)
        return d * jax.lax.rsqrt(var + eps) * g + b

    # ---------------- Attention branch ----------------
    xn = layernorm(x, g1_ref[...].astype(jnp.float32), b1_ref[...].astype(jnp.float32))

    # Single fused QKV projection: bf16 MXU inputs, f32 accumulation.
    qkv = jnp.dot(xn.astype(jnp.bfloat16), wqkv_ref[...],
                  preferred_element_type=jnp.float32)           # (N, 3C) f32

    # Fold softmax scale into q once, then cast matmul operands to bf16.
    q = (qkv[:, 0 * C:1 * C] * scale).astype(jnp.bfloat16)      # (N, C)
    k = qkv[:, 1 * C:2 * C].astype(jnp.bfloat16)
    v = qkv[:, 2 * C:3 * C].astype(jnp.bfloat16)

    # q @ k^T without an explicit transpose: contract over head_dim of both operands.
    nt_dims = (((1,), (1,)), ((), ()))

    for h in range(num_heads):                  # static, fully unrolled over heads
        qh = q[:, h * hd:(h + 1) * hd]
        kh = k[:, h * hd:(h + 1) * hd]
        vh = v[:, h * hd:(h + 1) * hd]
        s = jax.lax.dot_general(qh, kh, nt_dims,
                                preferred_element_type=jnp.float32)     # (N, N) f32
        s = s - jnp.max(s, axis=-1, keepdims=True)
        e = jnp.exp(s)
        p = e * pl.reciprocal(jnp.sum(e, axis=-1, keepdims=True), approx=True)
        oh = jnp.dot(p.astype(jnp.bfloat16), vh,
                     preferred_element_type=jnp.float32)                # (N, hd) f32
        # write this head's slice into the (N, C) scratch (no lane-axis concat)
        attn_scratch[:, h * hd:(h + 1) * hd] = oh

    proj = jnp.dot(attn_scratch[...].astype(jnp.bfloat16), wproj_ref[...],
                   preferred_element_type=jnp.float32) + bproj_ref[...].astype(jnp.float32)
    x1 = x + proj                                                       # residual 1

    # ---------------- MLP branch ----------------
    xn2 = layernorm(x1, g2_ref[...].astype(jnp.float32), b2_ref[...].astype(jnp.float32))
    h1 = jnp.dot(xn2.astype(jnp.bfloat16), wfc1_ref[...],
                 preferred_element_type=jnp.float32) + bfc1_ref[...].astype(jnp.float32)
    # exact GELU (nn.GELU default, erf form) in f32
    h1 = 0.5 * h1 * (1.0 + jax.lax.erf(h1 * (1.0 / math.sqrt(2.0))))
    h2 = jnp.dot(h1.astype(jnp.bfloat16), wfc2_ref[...],
                 preferred_element_type=jnp.float32) + bfc2_ref[...].astype(jnp.float32)

    o_ref[0] = (x1 + h2).astype(o_ref.dtype)                            # residual 2


def vit_block(x, params, *, num_heads, eps=1e-5):
    """x: (B, N, C) float32; params: dict of weights already transposed to (in, out)."""
    B, N, C = x.shape
    assert C % num_heads == 0
    hd = C // num_heads
    scale = hd ** -0.5
    hidden = params["wfc1"].shape[1]

    # Large matmul weights go to bf16 (MXU-native dtype, halves VMEM footprint and
    # HBM->VMEM DMA bytes); LN affine params and biases stay f32 (added to f32 accums).
    weight_args = (
        params["g1"].astype(jnp.float32), params["b1"].astype(jnp.float32),
        params["wqkv"].astype(jnp.bfloat16),
        params["wproj"].astype(jnp.bfloat16), params["bproj"].astype(jnp.float32),
        params["g2"].astype(jnp.float32), params["b2"].astype(jnp.float32),
        params["wfc1"].astype(jnp.bfloat16), params["bfc1"].astype(jnp.float32),
        params["wfc2"].astype(jnp.bfloat16), params["bfc2"].astype(jnp.float32),
    )

    def full_spec(arr):
        nd = arr.ndim
        # Constant index map -> same block every grid step (no re-DMA of the weights).
        return pl.BlockSpec(arr.shape, lambda *_args, _nd=nd: (0,) * _nd)

    kernel = functools.partial(_block_kernel, num_heads=num_heads, scale=scale, eps=eps)

    # --- VMEM budget: weights (pipeline double-buffers them) + in/out activation blocks
    # (double-buffered) + f32 intermediates (qkv, scores, h1, attn scratch), with headroom.
    w_bytes = sum(int(w.size) * w.dtype.itemsize for w in weight_args)
    act_bytes = 2 * 2 * N * C * 4                      # in + out blocks, double-buffered
    interm_bytes = 4 * (N * 3 * C + N * N + N * hidden + 2 * N * C)
    vmem_limit = int(1.5 * (2 * w_bytes + act_bytes + interm_bytes))
    vmem_limit = min(max(vmem_limit, 32 * 1024 * 1024), 64 * 1024 * 1024)

    # --- advisory cost estimate so XLA can schedule neighbouring ops around this call
    flops = 2 * B * N * (4 * C * C + 2 * N * C + 2 * C * hidden)
    transcendentals = B * (num_heads * N * N + N * hidden)
    bytes_accessed = int(w_bytes + 2 * B * N * C * 4)

    return pl.pallas_call(
        kernel,
        out_shape=jax.ShapeDtypeStruct((B, N, C), x.dtype),
        grid_spec=pltpu.PrefetchScalarGridSpec(
            num_scalar_prefetch=0,
            grid=(B,),
            in_specs=[pl.BlockSpec((1, N, C), lambda b: (b, 0, 0))]
                     + [full_spec(w) for w in weight_args],
            out_specs=pl.BlockSpec((1, N, C), lambda b: (b, 0, 0)),
            scratch_shapes=[pltpu.VMEM((N, C), jnp.float32)],
        ),
        compiler_params=pltpu.CompilerParams(
            dimension_semantics=("parallel",),
            vmem_limit_bytes=vmem_limit,
        ),
        cost_estimate=pl.CostEstimate(flops=flops,
                                      transcendentals=transcendentals,
                                      bytes_accessed=bytes_accessed),
    )(x, *weight_args)


def _reference(x, params, *, num_heads, eps=1e-5):
    """Pure-JAX f32 reference of the PyTorch Block.forward."""
    B, N, C = x.shape
    hd = C // num_heads
    scale = hd ** -0.5

    def ln(v, g, b):
        mu = jnp.mean(v, axis=-1, keepdims=True)
        var = jnp.mean((v - mu) ** 2, axis=-1, keepdims=True)
        return (v - mu) / jnp.sqrt(var + eps) * g + b

    xn = ln(x, params["g1"], params["b1"])
    qkv = xn @ params["wqkv"]                                   # (B, N, 3C)
    qkv = qkv.reshape(B, N, 3, num_heads, hd).transpose(2, 0, 3, 1, 4)
    q, k, v = qkv[0], qkv[1], qkv[2]                            # (B, H, N, hd)
    attn = jnp.einsum("bhnd,bhmd->bhnm", q, k) * scale
    attn = jax.nn.softmax(attn, axis=-1)
    o = jnp.einsum("bhnm,bhmd->bhnd", attn, v)
    o = o.transpose(0, 2, 1, 3).reshape(B, N, C)
    o = o @ params["wproj"] + params["bproj"]
    x1 = x + o

    xn2 = ln(x1, params["g2"], params["b2"])
    h = xn2 @ params["wfc1"] + params["bfc1"]
    h = 0.5 * h * (1.0 + jax.lax.erf(h / jnp.sqrt(2.0)))
    h = h @ params["wfc2"] + params["bfc2"]
    return x1 + h


if __name__ == "__main__":
    # Small but lane-dense shapes (C multiple of 128, N multiple of 8, B=2 grid steps).
    B, N, C = 2, 16, 128
    num_heads = 4
    mlp_ratio = 4.0
    hidden = int(C * mlp_ratio)

    key = jax.random.PRNGKey(0)
    ks = jax.random.split(key, 10)

    params = {
        "g1": jnp.ones((1, C), jnp.float32),
        "b1": jnp.zeros((1, C), jnp.float32),
        # nn.Linear(dim, 3*dim, bias=False), weight transposed to (in, out)
        "wqkv": jax.random.normal(ks[0], (C, 3 * C), jnp.float32) * 0.05,
        "wproj": jax.random.normal(ks[1], (C, C), jnp.float32) * 0.05,
        "bproj": jax.random.normal(ks[2], (1, C), jnp.float32) * 0.01,
        "g2": jnp.ones((1, C), jnp.float32),
        "b2": jnp.zeros((1, C), jnp.float32),
        "wfc1": jax.random.normal(ks[3], (C, hidden), jnp.float32) * 0.05,
        "bfc1": jax.random.normal(ks[4], (1, hidden), jnp.float32) * 0.01,
        "wfc2": jax.random.normal(ks[5], (hidden, C), jnp.float32) * 0.05,
        "bfc2": jnp.zeros((1, C), jnp.float32) + jax.random.normal(ks[6], (1, C), jnp.float32) * 0.01,
    }

    x = jax.random.normal(ks[7], (B, N, C), jnp.float32)

    out = vit_block(x, params, num_heads=num_heads)
    out = jax.block_until_ready(out)

    ref = _reference(x, params, num_heads=num_heads)
    assert out.shape == (B, N, C)
    max_err = float(jnp.max(jnp.abs(out - ref)))
    # bf16 matmul inputs (f32 accumulation) + approx softmax reciprocal => loose f32 tolerance
    assert jnp.allclose(out, ref, atol=2e-2, rtol=2e-2), f"max abs err {max_err}"

    print("KERNEL_OK")
</pallas_src>

<mosaic_0001>
module attributes {stable_mosaic.version = 11 : i64} {
  func.func @_block_kernel(%arg0: i32, %arg1: memref<1x16x128xf32, #tpu.memory_space<vmem>>, %arg2: memref<1x128xf32, #tpu.memory_space<vmem>>, %arg3: memref<1x128xf32, #tpu.memory_space<vmem>>, %arg4: memref<128x384xbf16, #tpu.memory_space<vmem>>, %arg5: memref<128x128xbf16, #tpu.memory_space<vmem>>, %arg6: memref<1x128xf32, #tpu.memory_space<vmem>>, %arg7: memref<1x128xf32, #tpu.memory_space<vmem>>, %arg8: memref<1x128xf32, #tpu.memory_space<vmem>>, %arg9: memref<128x512xbf16, #tpu.memory_space<vmem>>, %arg10: memref<1x512xf32, #tpu.memory_space<vmem>>, %arg11: memref<512x128xbf16, #tpu.memory_space<vmem>>, %arg12: memref<1x128xf32, #tpu.memory_space<vmem>>, %arg13: memref<1x16x128xf32, #tpu.memory_space<vmem>>, %arg14: memref<16x128xf32, #tpu.memory_space<vmem>>) attributes {dimension_semantics = [#tpu.dimension_semantics<parallel>], iteration_bounds = array<i64: 2>, scalar_prefetch = 0 : i64, scratch_operands = 1 : i64, tpu.core_type = #tpu.core_type<tc>, window_params = [{transform_indices = @transform_0, window_bounds = array<i64: 1, 16, 128>}, {pipeline_mode = #tpu.pipeline_mode<synchronous>, transform_indices = @transform_1, window_bounds = array<i64: 1, 128>}, {pipeline_mode = #tpu.pipeline_mode<synchronous>, transform_indices = @transform_2, window_bounds = array<i64: 1, 128>}, {pipeline_mode = #tpu.pipeline_mode<synchronous>, transform_indices = @transform_3, window_bounds = array<i64: 128, 384>}, {pipeline_mode = #tpu.pipeline_mode<synchronous>, transform_indices = @transform_4, window_bounds = array<i64: 128, 128>}, {pipeline_mode = #tpu.pipeline_mode<synchronous>, transform_indices = @transform_5, window_bounds = array<i64: 1, 128>}, {pipeline_mode = #tpu.pipeline_mode<synchronous>, transform_indices = @transform_6, window_bounds = array<i64: 1, 128>}, {pipeline_mode = #tpu.pipeline_mode<synchronous>, transform_indices = @transform_7, window_bounds = array<i64: 1, 128>}, {pipeline_mode = #tpu.pipeline_mode<synchronous>, transform_indices = @transform_8, window_bounds = array<i64: 128, 512>}, {pipeline_mode = #tpu.pipeline_mode<synchronous>, transform_indices = @transform_9, window_bounds = array<i64: 1, 512>}, {pipeline_mode = #tpu.pipeline_mode<synchronous>, transform_indices = @transform_10, window_bounds = array<i64: 512, 128>}, {pipeline_mode = #tpu.pipeline_mode<synchronous>, transform_indices = @transform_11, window_bounds = array<i64: 1, 128>}, {transform_indices = @transform_12, window_bounds = array<i64: 1, 16, 128>}]} {
    %c0 = arith.constant 0 : index
    %c0_0 = arith.constant 0 : index
    %c0_1 = arith.constant 0 : index
    %0 = vector.load %arg1[%c0, %c0_0, %c0_1] : memref<1x16x128xf32, #tpu.memory_space<vmem>>, vector<1x16x128xf32>
    %1 = vector.shape_cast %0 : vector<1x16x128xf32> to vector<16x128xf32>
    %c0_2 = arith.constant 0 : index
    %c0_3 = arith.constant 0 : index
    %2 = vector.load %arg2[%c0_2, %c0_3] : memref<1x128xf32, #tpu.memory_space<vmem>>, vector<1x128xf32>
    %c0_4 = arith.constant 0 : index
    %c0_5 = arith.constant 0 : index
    %3 = vector.load %arg3[%c0_4, %c0_5] : memref<1x128xf32, #tpu.memory_space<vmem>>, vector<1x128xf32>
    %cst = arith.constant dense<0.000000e+00> : vector<16xf32>
    %4 = vector.multi_reduction <add>, %1, %cst [1] : vector<16x128xf32> to vector<16xf32>
    %5 = vector.shape_cast %4 : vector<16xf32> to vector<16x1xf32>
    %cst_6 = arith.constant 1.280000e+02 : f32
    %6 = vector.broadcast %cst_6 : f32 to vector<16x1xf32>
    %7 = arith.divf %5, %6 : vector<16x1xf32>
    %8 = vector.broadcast %7 : vector<16x1xf32> to vector<16x128xf32>
    %9 = arith.subf %1, %8 : vector<16x128xf32>
    %10 = arith.mulf %9, %9 : vector<16x128xf32>
    %cst_7 = arith.constant dense<0.000000e+00> : vector<16xf32>
    %11 = vector.multi_reduction <add>, %10, %cst_7 [1] : vector<16x128xf32> to vector<16xf32>
    %12 = vector.shape_cast %11 : vector<16xf32> to vector<16x1xf32>
    %cst_8 = arith.constant 1.280000e+02 : f32
    %13 = vector.broadcast %cst_8 : f32 to vector<16x1xf32>
    %14 = arith.divf %12, %13 : vector<16x1xf32>
    %cst_9 = arith.constant 9.99999974E-6 : f32
    %15 = vector.broadcast %cst_9 : f32 to vector<16x1xf32>
    %16 = arith.addf %14, %15 : vector<16x1xf32>
    %17 = math.rsqrt %16 : vector<16x1xf32>
    %18 = vector.broadcast %17 : vector<16x1xf32> to vector<16x128xf32>
    %19 = arith.mulf %9, %18 : vector<16x128xf32>
    %20 = vector.broadcast %2 : vector<1x128xf32> to vector<16x128xf32>
    %21 = arith.mulf %19, %20 : vector<16x128xf32>
    %22 = vector.broadcast %3 : vector<1x128xf32> to vector<16x128xf32>
    %23 = arith.addf %21, %22 : vector<16x128xf32>
    %24 = arith.truncf %23 : vector<16x128xf32> to vector<16x128xbf16>
    %c0_10 = arith.constant 0 : index
    %c0_11 = arith.constant 0 : index
    %25 = vector.load %arg4[%c0_10, %c0_11] : memref<128x384xbf16, #tpu.memory_space<vmem>>, vector<128x384xbf16>
    %cst_12 = arith.constant dense<0.000000e+00> : vector<16x384xf32>
    %26 = tpu.matmul %24, %25, %cst_12 {dimension_numbers = #tpu.dot_dimension_numbers<[1], [0], [0], [1], [0, 0, 1, 1], [], []>} : vector<16x128xbf16>, vector<128x384xbf16>, vector<16x384xf32> -> vector<16x384xf32>
    %27 = vector.extract_strided_slice %26 {offsets = [0, 0], sizes = [16, 128], strides = [1, 1]} : vector<16x384xf32> to vector<16x128xf32>
    %cst_13 = arith.constant 0.176776692 : f32
    %28 = vector.broadcast %cst_13 : f32 to vector<16x128xf32>
    %29 = arith.mulf %27, %28 : vector<16x128xf32>
    %30 = arith.truncf %29 : vector<16x128xf32> to vector<16x128xbf16>
    %31 = vector.extract_strided_slice %26 {offsets = [0, 128], sizes = [16, 128], strides = [1, 1]} : vector<16x384xf32> to vector<16x128xf32>
    %32 = arith.truncf %31 : vector<16x128xf32> to vector<16x128xbf16>
    %33 = vector.extract_strided_slice %26 {offsets = [0, 256], sizes = [16, 128], strides = [1, 1]} : vector<16x384xf32> to vector<16x128xf32>
    %34 = arith.truncf %33 : vector<16x128xf32> to vector<16x128xbf16>
    %35 = vector.extract_strided_slice %30 {offsets = [0, 0], sizes = [16, 32], strides = [1, 1]} : vector<16x128xbf16> to vector<16x32xbf16>
    %36 = vector.extract_strided_slice %32 {offsets = [0, 0], sizes = [16, 32], strides = [1, 1]} : vector<16x128xbf16> to vector<16x32xbf16>
    %37 = vector.extract_strided_slice %34 {offsets = [0, 0], sizes = [16, 32], strides = [1, 1]} : vector<16x128xbf16> to vector<16x32xbf16>
    %cst_14 = arith.constant dense<0.000000e+00> : vector<16x16xf32>
    %38 = tpu.matmul %35, %36, %cst_14 {dimension_numbers = #tpu.dot_dimension_numbers<[1], [1], [0], [0], [0, 0, 1, 0], [], []>} : vector<16x32xbf16>, vector<16x32xbf16>, vector<16x16xf32> -> vector<16x16xf32>
    %cst_15 = arith.constant dense<0xFF800000> : vector<16xf32>
    %39 = vector.multi_reduction <maximumf>, %38, %cst_15 [1] : vector<16x16xf32> to vector<16xf32>
    %40 = vector.shape_cast %39 : vector<16xf32> to vector<16x1xf32>
    %41 = vector.broadcast %40 : vector<16x1xf32> to vector<16x16xf32>
    %42 = arith.subf %38, %41 : vector<16x16xf32>
    %43 = math.exp %42 : vector<16x16xf32>
    %cst_16 = arith.constant dense<0.000000e+00> : vector<16xf32>
    %44 = vector.multi_reduction <add>, %43, %cst_16 [1] : vector<16x16xf32> to vector<16xf32>
    %45 = vector.shape_cast %44 : vector<16xf32> to vector<16x1xf32>
    %46 = tpu.reciprocal %45 {approx = true} : vector<16x1xf32> -> vector<16x1xf32>
    %47 = vector.broadcast %46 : vector<16x1xf32> to vector<16x16xf32>
    %48 = arith.mulf %43, %47 : vector<16x16xf32>
    %49 = arith.truncf %48 : vector<16x16xf32> to vector<16x16xbf16>
    %cst_17 = arith.constant dense<0.000000e+00> : vector<16x32xf32>
    %50 = tpu.matmul %49, %37, %cst_17 {dimension_numbers = #tpu.dot_dimension_numbers<[1], [0], [0], [1], [0, 0, 1, 1], [], []>} : vector<16x16xbf16>, vector<16x32xbf16>, vector<16x32xf32> -> vector<16x32xf32>
    %c0_18 = arith.constant 0 : index
    %c0_19 = arith.constant 0 : index
    %51 = vector.load %arg14[%c0_18, %c0_19] : memref<16x128xf32, #tpu.memory_space<vmem>>, vector<16x32xf32>
    tpu.vector_store %arg14[%c0_18, %c0_19], %50 {strides = array<i32>} : memref<16x128xf32, #tpu.memory_space<vmem>>, vector<16x32xf32>,
    %52 = vector.extract_strided_slice %30 {offsets = [0, 32], sizes = [16, 32], strides = [1, 1]} : vector<16x128xbf16> to vector<16x32xbf16>
    %53 = vector.extract_strided_slice %32 {offsets = [0, 32], sizes = [16, 32], strides = [1, 1]} : vector<16x128xbf16> to vector<16x32xbf16>
    %54 = vector.extract_strided_slice %34 {offsets = [0, 32], sizes = [16, 32], strides = [1, 1]} : vector<16x128xbf16> to vector<16x32xbf16>
    %cst_20 = arith.constant dense<0.000000e+00> : vector<16x16xf32>
    %55 = tpu.matmul %52, %53, %cst_20 {dimension_numbers = #tpu.dot_dimension_numbers<[1], [1], [0], [0], [0, 0, 1, 0], [], []>} : vector<16x32xbf16>, vector<16x32xbf16>, vector<16x16xf32> -> vector<16x16xf32>
    %cst_21 = arith.constant dense<0xFF800000> : vector<16xf32>
    %56 = vector.multi_reduction <maximumf>, %55, %cst_21 [1] : vector<16x16xf32> to vector<16xf32>
    %57 = vector.shape_cast %56 : vector<16xf32> to vector<16x1xf32>
    %58 = vector.broadcast %57 : vector<16x1xf32> to vector<16x16xf32>
    %59 = arith.subf %55, %58 : vector<16x16xf32>
    %60 = math.exp %59 : vector<16x16xf32>
    %cst_22 = arith.constant dense<0.000000e+00> : vector<16xf32>
    %61 = vector.multi_reduction <add>, %60, %cst_22 [1] : vector<16x16xf32> to vector<16xf32>
    %62 = vector.shape_cast %61 : vector<16xf32> to vector<16x1xf32>
    %63 = tpu.reciprocal %62 {approx = true} : vector<16x1xf32> -> vector<16x1xf32>
    %64 = vector.broadcast %63 : vector<16x1xf32> to vector<16x16xf32>
    %65 = arith.mulf %60, %64 : vector<16x16xf32>
    %66 = arith.truncf %65 : vector<16x16xf32> to vector<16x16xbf16>
    %cst_23 = arith.constant dense<0.000000e+00> : vector<16x32xf32>
    %67 = tpu.matmul %66, %54, %cst_23 {dimension_numbers = #tpu.dot_dimension_numbers<[1], [0], [0], [1], [0, 0, 1, 1], [], []>} : vector<16x16xbf16>, vector<16x32xbf16>, vector<16x32xf32> -> vector<16x32xf32>
    %c0_24 = arith.constant 0 : index
    %c32 = arith.constant 32 : index
    %68 = vector.load %arg14[%c0_24, %c32] : memref<16x128xf32, #tpu.memory_space<vmem>>, vector<16x32xf32>
    tpu.vector_store %arg14[%c0_24, %c32], %67 {strides = array<i32>} : memref<16x128xf32, #tpu.memory_space<vmem>>, vector<16x32xf32>,
    %69 = vector.extract_strided_slice %30 {offsets = [0, 64], sizes = [16, 32], strides = [1, 1]} : vector<16x128xbf16> to vector<16x32xbf16>
    %70 = vector.extract_strided_slice %32 {offsets = [0, 64], sizes = [16, 32], strides = [1, 1]} : vector<16x128xbf16> to vector<16x32xbf16>
    %71 = vector.extract_strided_slice %34 {offsets = [0, 64], sizes = [16, 32], strides = [1, 1]} : vector<16x128xbf16> to vector<16x32xbf16>
    %cst_25 = arith.constant dense<0.000000e+00> : vector<16x16xf32>
    %72 = tpu.matmul %69, %70, %cst_25 {dimension_numbers = #tpu.dot_dimension_numbers<[1], [1], [0], [0], [0, 0, 1, 0], [], []>} : vector<16x32xbf16>, vector<16x32xbf16>, vector<16x16xf32> -> vector<16x16xf32>
    %cst_26 = arith.constant dense<0xFF800000> : vector<16xf32>
    %73 = vector.multi_reduction <maximumf>, %72, %cst_26 [1] : vector<16x16xf32> to vector<16xf32>
    %74 = vector.shape_cast %73 : vector<16xf32> to vector<16x1xf32>
    %75 = vector.broadcast %74 : vector<16x1xf32> to vector<16x16xf32>
    %76 = arith.subf %72, %75 : vector<16x16xf32>
    %77 = math.exp %76 : vector<16x16xf32>
    %cst_27 = arith.constant dense<0.000000e+00> : vector<16xf32>
    %78 = vector.multi_reduction <add>, %77, %cst_27 [1] : vector<16x16xf32> to vector<16xf32>
    %79 = vector.shape_cast %78 : vector<16xf32> to vector<16x1xf32>
    %80 = tpu.reciprocal %79 {approx = true} : vector<16x1xf32> -> vector<16x1xf32>
    %81 = vector.broadcast %80 : vector<16x1xf32> to vector<16x16xf32>
    %82 = arith.mulf %77, %81 : vector<16x16xf32>
    %83 = arith.truncf %82 : vector<16x16xf32> to vector<16x16xbf16>
    %cst_28 = arith.constant dense<0.000000e+00> : vector<16x32xf32>
    %84 = tpu.matmul %83, %71, %cst_28 {dimension_numbers = #tpu.dot_dimension_numbers<[1], [0], [0], [1], [0, 0, 1, 1], [], []>} : vector<16x16xbf16>, vector<16x32xbf16>, vector<16x32xf32> -> vector<16x32xf32>
    %c0_29 = arith.constant 0 : index
    %c64 = arith.constant 64 : index
    %85 = vector.load %arg14[%c0_29, %c64] : memref<16x128xf32, #tpu.memory_space<vmem>>, vector<16x32xf32>
    tpu.vector_store %arg14[%c0_29, %c64], %84 {strides = array<i32>} : memref<16x128xf32, #tpu.memory_space<vmem>>, vector<16x32xf32>,
    %86 = vector.extract_strided_slice %30 {offsets = [0, 96], sizes = [16, 32], strides = [1, 1]} : vector<16x128xbf16> to vector<16x32xbf16>
    %87 = vector.extract_strided_slice %32 {offsets = [0, 96], sizes = [16, 32], strides = [1, 1]} : vector<16x128xbf16> to vector<16x32xbf16>
    %88 = vector.extract_strided_slice %34 {offsets = [0, 96], sizes = [16, 32], strides = [1, 1]} : vector<16x128xbf16> to vector<16x32xbf16>
    %cst_30 = arith.constant dense<0.000000e+00> : vector<16x16xf32>
    %89 = tpu.matmul %86, %87, %cst_30 {dimension_numbers = #tpu.dot_dimension_numbers<[1], [1], [0], [0], [0, 0, 1, 0], [], []>} : vector<16x32xbf16>, vector<16x32xbf16>, vector<16x16xf32> -> vector<16x16xf32>
    %cst_31 = arith.constant dense<0xFF800000> : vector<16xf32>
    %90 = vector.multi_reduction <maximumf>, %89, %cst_31 [1] : vector<16x16xf32> to vector<16xf32>
    %91 = vector.shape_cast %90 : vector<16xf32> to vector<16x1xf32>
    %92 = vector.broadcast %91 : vector<16x1xf32> to vector<16x16xf32>
    %93 = arith.subf %89, %92 : vector<16x16xf32>
    %94 = math.exp %93 : vector<16x16xf32>
    %cst_32 = arith.constant dense<0.000000e+00> : vector<16xf32>
    %95 = vector.multi_reduction <add>, %94, %cst_32 [1] : vector<16x16xf32> to vector<16xf32>
    %96 = vector.shape_cast %95 : vector<16xf32> to vector<16x1xf32>
    %97 = tpu.reciprocal %96 {approx = true} : vector<16x1xf32> -> vector<16x1xf32>
    %98 = vector.broadcast %97 : vector<16x1xf32> to vector<16x16xf32>
    %99 = arith.mulf %94, %98 : vector<16x16xf32>
    %100 = arith.truncf %99 : vector<16x16xf32> to vector<16x16xbf16>
    %cst_33 = arith.constant dense<0.000000e+00> : vector<16x32xf32>
    %101 = tpu.matmul %100, %88, %cst_33 {dimension_numbers = #tpu.dot_dimension_numbers<[1], [0], [0], [1], [0, 0, 1, 1], [], []>} : vector<16x16xbf16>, vector<16x32xbf16>, vector<16x32xf32> -> vector<16x32xf32>
    %c0_34 = arith.constant 0 : index
    %c96 = arith.constant 96 : index
    %102 = vector.load %arg14[%c0_34, %c96] : memref<16x128xf32, #tpu.memory_space<vmem>>, vector<16x32xf32>
    tpu.vector_store %arg14[%c0_34, %c96], %101 {strides = array<i32>} : memref<16x128xf32, #tpu.memory_space<vmem>>, vector<16x32xf32>,
    %c0_35 = arith.constant 0 : index
    %c0_36 = arith.constant 0 : index
    %103 = vector.load %arg14[%c0_35, %c0_36] : memref<16x128xf32, #tpu.memory_space<vmem>>, vector<16x128xf32>
    %104 = arith.truncf %103 : vector<16x128xf32> to vector<16x128xbf16>
    %c0_37 = arith.constant 0 : index
    %c0_38 = arith.constant 0 : index
    %105 = vector.load %arg5[%c0_37, %c0_38] : memref<128x128xbf16, #tpu.memory_space<vmem>>, vector<128x128xbf16>
    %cst_39 = arith.constant dense<0.000000e+00> : vector<16x128xf32>
    %106 = tpu.matmul %104, %105, %cst_39 {dimension_numbers = #tpu.dot_dimension_numbers<[1], [0], [0], [1], [0, 0, 1, 1], [], []>} : vector<16x128xbf16>, vector<128x128xbf16>, vector<16x128xf32> -> vector<16x128xf32>
    %c0_40 = arith.constant 0 : index
    %c0_41 = arith.constant 0 : index
    %107 = vector.load %arg6[%c0_40, %c0_41] : memref<1x128xf32, #tpu.memory_space<vmem>>, vector<1x128xf32>
    %108 = vector.broadcast %107 : vector<1x128xf32> to vector<16x128xf32>
    %109 = arith.addf %106, %108 : vector<16x128xf32>
    %110 = arith.addf %1, %109 : vector<16x128xf32>
    %c0_42 = arith.constant 0 : index
    %c0_43 = arith.constant 0 : index
    %111 = vector.load %arg7[%c0_42, %c0_43] : memref<1x128xf32, #tpu.memory_space<vmem>>, vector<1x128xf32>
    %c0_44 = arith.constant 0 : index
    %c0_45 = arith.constant 0 : index
    %112 = vector.load %arg8[%c0_44, %c0_45] : memref<1x128xf32, #tpu.memory_space<vmem>>, vector<1x128xf32>
    %cst_46 = arith.constant dense<0.000000e+00> : vector<16xf32>
    %113 = vector.multi_reduction <add>, %110, %cst_46 [1] : vector<16x128xf32> to vector<16xf32>
    %114 = vector.shape_cast %113 : vector<16xf32> to vector<16x1xf32>
    %cst_47 = arith.constant 1.280000e+02 : f32
    %115 = vector.broadcast %cst_47 : f32 to vector<16x1xf32>
    %116 = arith.divf %114, %115 : vector<16x1xf32>
    %117 = vector.broadcast %116 : vector<16x1xf32> to vector<16x128xf32>
    %118 = arith.subf %110, %117 : vector<16x128xf32>
    %119 = arith.mulf %118, %118 : vector<16x128xf32>
    %cst_48 = arith.constant dense<0.000000e+00> : vector<16xf32>
    %120 = vector.multi_reduction <add>, %119, %cst_48 [1] : vector<16x128xf32> to vector<16xf32>
    %121 = vector.shape_cast %120 : vector<16xf32> to vector<16x1xf32>
    %cst_49 = arith.constant 1.280000e+02 : f32
    %122 = vector.broadcast %cst_49 : f32 to vector<16x1xf32>
    %123 = arith.divf %121, %122 : vector<16x1xf32>
    %cst_50 = arith.constant 9.99999974E-6 : f32
    %124 = vector.broadcast %cst_50 : f32 to vector<16x1xf32>
    %125 = arith.addf %123, %124 : vector<16x1xf32>
    %126 = math.rsqrt %125 : vector<16x1xf32>
    %127 = vector.broadcast %126 : vector<16x1xf32> to vector<16x128xf32>
    %128 = arith.mulf %118, %127 : vector<16x128xf32>
    %129 = vector.broadcast %111 : vector<1x128xf32> to vector<16x128xf32>
    %130 = arith.mulf %128, %129 : vector<16x128xf32>
    %131 = vector.broadcast %112 : vector<1x128xf32> to vector<16x128xf32>
    %132 = arith.addf %130, %131 : vector<16x128xf32>
    %133 = arith.truncf %132 : vector<16x128xf32> to vector<16x128xbf16>
    %c0_51 = arith.constant 0 : index
    %c0_52 = arith.constant 0 : index
    %134 = vector.load %arg9[%c0_51, %c0_52] : memref<128x512xbf16, #tpu.memory_space<vmem>>, vector<128x512xbf16>
    %cst_53 = arith.constant dense<0.000000e+00> : vector<16x512xf32>
    %135 = tpu.matmul %133, %134, %cst_53 {dimension_numbers = #tpu.dot_dimension_numbers<[1], [0], [0], [1], [0, 0, 1, 1], [], []>} : vector<16x128xbf16>, vector<128x512xbf16>, vector<16x512xf32> -> vector<16x512xf32>
    %c0_54 = arith.constant 0 : index
    %c0_55 = arith.constant 0 : index
    %136 = vector.load %arg10[%c0_54, %c0_55] : memref<1x512xf32, #tpu.memory_space<vmem>>, vector<1x512xf32>
    %137 = vector.broadcast %136 : vector<1x512xf32> to vector<16x512xf32>
    %138 = arith.addf %135, %137 : vector<16x512xf32>
    %cst_56 = arith.constant 5.000000e-01 : f32
    %139 = vector.broadcast %cst_56 : f32 to vector<16x512xf32>
    %140 = arith.mulf %139, %138 : vector<16x512xf32>
    %cst_57 = arith.constant 0.707106769 : f32
    %141 = vector.broadcast %cst_57 : f32 to vector<16x512xf32>
    %142 = arith.mulf %138, %141 : vector<16x512xf32>
    %143 = math.erf %142 : vector<16x512xf32>
    %cst_58 = arith.constant 1.000000e+00 : f32
    %144 = vector.broadcast %cst_58 : f32 to vector<16x512xf32>
    %145 = arith.addf %144, %143 : vector<16x512xf32>
    %146 = arith.mulf %140, %145 : vector<16x512xf32>
    %147 = arith.truncf %146 : vector<16x512xf32> to vector<16x512xbf16>
    %c0_59 = arith.constant 0 : index
    %c0_60 = arith.constant 0 : index
    %148 = vector.load %arg11[%c0_59, %c0_60] : memref<512x128xbf16, #tpu.memory_space<vmem>>, vector<512x128xbf16>
    %cst_61 = arith.constant dense<0.000000e+00> : vector<16x128xf32>
    %149 = tpu.matmul %147, %148, %cst_61 {dimension_numbers = #tpu.dot_dimension_numbers<[1], [0], [0], [1], [0, 0, 1, 1], [], []>} : vector<16x512xbf16>, vector<512x128xbf16>, vector<16x128xf32> -> vector<16x128xf32>
    %c0_62 = arith.constant 0 : index
    %c0_63 = arith.constant 0 : index
    %150 = vector.load %arg12[%c0_62, %c0_63] : memref<1x128xf32, #tpu.memory_space<vmem>>, vector<1x128xf32>
    %151 = vector.broadcast %150 : vector<1x128xf32> to vector<16x128xf32>
    %152 = arith.addf %149, %151 : vector<16x128xf32>
    %153 = arith.addf %110, %152 : vector<16x128xf32>
    %c0_64 = arith.constant 0 : index
    %c0_65 = arith.constant 0 : index
    %c0_66 = arith.constant 0 : index
    %154 = vector.load %arg13[%c0_64, %c0_65, %c0_66] : memref<1x16x128xf32, #tpu.memory_space<vmem>>, vector<1x16x128xf32>
    %155 = vector.shape_cast %154 : vector<1x16x128xf32> to vector<16x128xf32>
    %156 = vector.shape_cast %153 : vector<16x128xf32> to vector<1x16x128xf32>
    tpu.vector_store %arg13[%c0_64, %c0_65, %c0_66], %156 {strides = array<i32>} : memref<1x16x128xf32, #tpu.memory_space<vmem>>, vector<1x16x128xf32>,
    return
  }
  func.func @transform_0(%arg0: i32) -> (i32, i32, i32) {
    %c0_i32 = arith.constant 0 : i32
    %c0_i32_0 = arith.constant 0 : i32
    %c0_i32_1 = arith.constant 0 : i32
    return %arg0, %c0_i32, %c0_i32_0 : i32, i32, i32
  }
  func.func @transform_1(%arg0: i32) -> (i32, i32) {
    %c0_i32 = arith.constant 0 : i32
    %c0_i32_0 = arith.constant 0 : i32
    %c0_i32_1 = arith.constant 0 : i32
    return %c0_i32, %c0_i32_0 : i32, i32
  }
  func.func @transform_2(%arg0: i32) -> (i32, i32) {
    %c0_i32 = arith.constant 0 : i32
    %c0_i32_0 = arith.constant 0 : i32
    %c0_i32_1 = arith.constant 0 : i32
    return %c0_i32, %c0_i32_0 : i32, i32
  }
  func.func @transform_3(%arg0: i32) -> (i32, i32) {
    %c0_i32 = arith.constant 0 : i32
    %c0_i32_0 = arith.constant 0 : i32
    %c0_i32_1 = arith.constant 0 : i32
    return %c0_i32, %c0_i32_0 : i32, i32
  }
  func.func @transform_4(%arg0: i32) -> (i32, i32) {
    %c0_i32 = arith.constant 0 : i32
    %c0_i32_0 = arith.constant 0 : i32
    %c0_i32_1 = arith.constant 0 : i32
    return %c0_i32, %c0_i32_0 : i32, i32
  }
  func.func @transform_5(%arg0: i32) -> (i32, i32) {
    %c0_i32 = arith.constant 0 : i32
    %c0_i32_0 = arith.constant 0 : i32
    %c0_i32_1 = arith.constant 0 : i32
    return %c0_i32, %c0_i32_0 : i32, i32
  }
  func.func @transform_6(%arg0: i32) -> (i32, i32) {
    %c0_i32 = arith.constant 0 : i32
    %c0_i32_0 = arith.constant 0 : i32
    %c0_i32_1 = arith.constant 0 : i32
    return %c0_i32, %c0_i32_0 : i32, i32
  }
  func.func @transform_7(%arg0: i32) -> (i32, i32) {
    %c0_i32 = arith.constant 0 : i32
    %c0_i32_0 = arith.constant 0 : i32
    %c0_i32_1 = arith.constant 0 : i32
    return %c0_i32, %c0_i32_0 : i32, i32
  }
  func.func @transform_8(%arg0: i32) -> (i32, i32) {
    %c0_i32 = arith.constant 0 : i32
    %c0_i32_0 = arith.constant 0 : i32
    %c0_i32_1 = arith.constant 0 : i32
    return %c0_i32, %c0_i32_0 : i32, i32
  }
  func.func @transform_9(%arg0: i32) -> (i32, i32) {
    %c0_i32 = arith.constant 0 : i32
    %c0_i32_0 = arith.constant 0 : i32
    %c0_i32_1 = arith.constant 0 : i32
    return %c0_i32, %c0_i32_0 : i32, i32
  }
  func.func @transform_10(%arg0: i32) -> (i32, i32) {
    %c0_i32 = arith.constant 0 : i32
    %c0_i32_0 = arith.constant 0 : i32
    %c0_i32_1 = arith.constant 0 : i32
    return %c0_i32, %c0_i32_0 : i32, i32
  }
  func.func @transform_11(%arg0: i32) -> (i32, i32) {
    %c0_i32 = arith.constant 0 : i32
    %c0_i32_0 = arith.constant 0 : i32
    %c0_i32_1 = arith.constant 0 : i32
    return %c0_i32, %c0_i32_0 : i32, i32
  }
  func.func @transform_12(%arg0: i32) -> (i32, i32, i32) {
    %c0_i32 = arith.constant 0 : i32
    %c0_i32_0 = arith.constant 0 : i32
    %c0_i32_1 = arith.constant 0 : i32
    return %arg0, %c0_i32, %c0_i32_0 : i32, i32, i32
  }
}

</mosaic_0001>

<bundles_post_ra>
// kernel: tpu_custom_call.1
= control target key start
LH: loop header
LB: loop body
LE: loop exit
PB: predicated region body
PF: predicated region fallthrough
CT: control target
= control target key end

     0   :  { %s3599_s0 = inlined_call_operand.hbm [shape: f32[2,16,128], index: 0, kind: input, shape index: {}]   ;;  %s3600_s1 = inlined_call_operand.vmem [shape: f32[1,128], index: 1, kind: input, shape index: {}]   ;;  %s3601_s2 = inlined_call_operand.vmem [shape: f32[1,128], index: 2, kind: input, shape index: {}]   ;;  %s3602_s3 = inlined_call_operand.hbm [shape: bf16[128,384], index: 3, kind: input, shape index: {}]   ;;  %s3603_s4 = inlined_call_operand.hbm [shape: bf16[128,128], index: 4, kind: input, shape index: {}]   ;;  %s3604_s5 = inlined_call_operand.vmem [shape: f32[1,128], index: 5, kind: input, shape index: {}]   ;;  %s3605_s6 = inlined_call_operand.vmem [shape: f32[1,128], index: 6, kind: input, shape index: {}]   ;;  %s3606_s7 = inlined_call_operand.vmem [shape: f32[1,128], index: 7, kind: input, shape index: {}]   ;;  %s3607_s8 = inlined_call_operand.hbm [shape: bf16[128,512], index: 8, kind: input, shape index: {}]   ;;  %s3608_s9 = inlined_call_operand.vmem [shape: f32[1,512], index: 9, kind: input, shape index: {}]   ;;  %s3609_s10 = inlined_call_operand.hbm [shape: bf16[512,128], index: 10, kind: input, shape index: {}]   ;;  %s3610_s11 = inlined_call_operand.vmem [shape: f32[1,128], index: 11, kind: input, shape index: {}]   ;;  %s3611_s12 = inlined_call_operand.hbm [shape: f32[2,16,128], index: 12, kind: output, shape index: {}]  }
   0x1   :  { %3618 = sst [smem:[#allocation19_spill]] %s3602_s3 }
   0x2   :  { %3619 = sst [smem:[#allocation20_spill]] %s3608_s9 }
   0x3   :  { %3620 = sst [smem:[#allocation21_spill]] %s3610_s11 }
   0x4   :  { %3621 = sst [smem:[#allocation22_spill]] %s3611_s12 }
   0x5   :  { %17 = vsyncpa [#allocation4], 0 }
   0x6   :  { %19 = vsyncpa [#allocation4 + $0x1], 0 }
   0x7   :  { %20 = vsyncpa [#allocation7], 0 }
   0x8   :  { %21 = vsyncpa [#allocation10], 0 }
   0x9   :  { %22 = vsyncpa [#allocation5], 0 }
   0xa   :  { %24 = vsyncpa [#allocation5 + $0x1], 0  ;;  %s3162_s21 = smov 0   ;;  %s3164_s22 = smov 0  }
   0xb   :  { %s3166_s23 = smov 0   ;;  %s3168_s24 = smov 0  }
   0xc LB: > { %3622 = sst [smem:[#allocation17_spill]] %s3061_s21  ;;  %s3183_s25 = sadd.s32 4294967295, %s3073_s24   ;;  %s3073_s24 = sphi %s3168_s24, %s3649_s24   ;;  %s3069_s23 = sphi %s3166_s23, %s3648_s23   ;;  %s3065_s22 = sphi %s3164_s22, %s3647_s22   ;;  %s3061_s21 = sphi %s3162_s21, %s3646_s21  }
   0xd   : > { %s2277_s26 = sadd.s32 4294967294, %s3073_s24   ;;  %p50_p0 = scmp.ne.s32.totalorder %s3065_s22, %s3061_s21 }
   0xe   : > { %p3613_p1 = scmp.eq.s32.totalorder %s3183_s25, 0  ;;  %p311_p3 = scmp.eq.s32.totalorder %s2277_s26, 1 }
   0xf   : > { %p2278_p5 = scmp.ge.s32.totalorder %s3073_s24, 1  ;;  %p318_p7 = scmp.lt.s32.totalorder %s3073_s24, 3 }
  0x10   : > { %p3192_p4 = por %p3613_p1, %p50_p0  ;;  %p3197_p6 = por %p311_p3, %p50_p0 }
  0x11   : > { %p3202_p8 = pnand %p2278_p5, %p318_p7  ;;  %s3075_s30 = smov [#allocation6]  }
  0x12   : > { %s3623_s27 = scalar_select %p3192_p4, 1, 0 }
  0x13   : > { %s3624_s28 = scalar_select %p3197_p6, 1, 0 }
  0x14   : > { %s3626_s29 = scalar_select %p3202_p8, 1, 0 }
  0x15   : > { %3625 = sst [smem:[#allocation18_spill]] %s3624_s28  ;;  %s336_s13 = sshll.u32 %s3075_s30, 4  ;;  %s3206_s13 = int_to_ptr.vmem [resolvable:$true] %s336_s13 }
  0x16   : > { %p2597_p9 = pneg %p3202_p8  ;;  %s3076_s15 = smov [#allocation9]  }
  0x17   : > { %s371_s16 = sshll.u32 %s3076_s15, 4  ;;  %s3628_s3 = sld [smem:[#allocation19_spill]]  ;;  %s3217_s16 = int_to_ptr.vmem [resolvable:$true] %s371_s16 }
  0x18   : > { %p3213_p11 = pnand %p2597_p9, %p3613_p1 }
  0x1a   : > { %p3227_p13 = pneg %p3213_p11 }
  0x1d   : > { %s2857_s19 = scalar_lea.hbm %s3628_s3, 3072 }
  0x1e   : > { %p2858_p12 = scmp.ne.s32.totalorder %s3628_s3, %s2857_s19  ;;  %p2864_p5 = scmp.lt.u32.totalorder %s2857_s19, %s3628_s3 }
  0x20   : > { %p2860_p0 = pnand %p3227_p13, %p2858_p12 }
  0x22   : > { %p2861_p3 = pneg %p2860_p0 }
  0x24   : > { %p2866_p7 = pnand %p2864_p5, %p2861_p3 }
  0x26   : > { %2869 = shalt.err (!%p2866_p7)
}
  0x27   : > { %s2870_s17 = scalar_lea.vmem %s3206_s13, 3072  ;;  %p2878_p2 = scmp.lt.s32.totalorder %s3206_s13, %s3206_s13 }
  0x28   : > { %p2871_p9 = scmp.ne.s32.totalorder %s3206_s13, %s2870_s17  ;;  %p2879_p6 = scmp.lt.s32.totalorder %s2870_s17, %s2870_s17 }
  0x2a   : > { %p2873_p10 = pnand %p2871_p9, %p3227_p13  ;;  %p2880_p12 = por %p2879_p6, %p2878_p2 }
  0x2c   : > { %p2874_p1 = pneg %p2873_p10 }
  0x2e   : > { %p2881_p0 = pnand %p2880_p12, %p2874_p1 }
  0x30   : > { %2884 = shalt.err (!%p2881_p0)
}
  0x31   : > { %s3077_s18 = smov 192   ;;  %s3078_s28 = smov 12  }
  0x32   : > { %2600 = dma.hbm_to_vmem [thread:$0]  (!%p3213_p11), %s3628_s3, 3072, %s3206_s13, [#allocation7], %s3077_s18, %s3077_s18, %s3078_s28  }
  0x33   : > { %s2885_s21 = scalar_lea.hbm %s3607_s8, 4096 }
  0x34   : > { %p2886_p2 = scmp.ne.s32.totalorder %s3607_s8, %s2885_s21  ;;  %p2892_p10 = scmp.lt.u32.totalorder %s2885_s21, %s3607_s8 }
  0x36   : > { %p2888_p1 = pnand %p2886_p2, %p3227_p13 }
  0x38   : > { %p2889_p6 = pneg %p2888_p1 }
  0x3a   : > { %p2894_p3 = pnand %p2892_p10, %p2889_p6 }
  0x3c   : > { %2897 = shalt.err (!%p2894_p3)
}
  0x3d   : > { %s2898_s13 = scalar_lea.vmem %s3217_s16, 4096  ;;  %p2906_p12 = scmp.lt.s32.totalorder %s3217_s16, %s3217_s16 }
  0x3e   : > { %p2899_p5 = scmp.ne.s32.totalorder %s3217_s16, %s2898_s13  ;;  %p2907_p0 = scmp.lt.s32.totalorder %s2898_s13, %s2898_s13 }
  0x40   : > { %p2901_p7 = pnand %p2899_p5, %p3227_p13  ;;  %p2908_p2 = por %p2907_p0, %p2906_p12 }
  0x42   : > { %p2902_p9 = pneg %p2901_p7 }
  0x44   : > { %p2909_p1 = pnand %p2908_p2, %p2902_p9 }
  0x46   : > { %2912 = shalt.err (!%p2909_p1)
}
  0x47   : > { %s3079_s11 = smov 256   ;;  %s3080_s9 = smov 16  }
  0x48   : > { %2606 = dma.hbm_to_vmem [thread:$0]  (!%p3213_p11), %s3607_s8, 4096, %s3217_s16, [#allocation10], %s3079_s11, %s3079_s11, %s3080_s9  }
  0x49   : > { %s3081_s18 = smov [#allocation8]   ;;  %s2913_s26 = scalar_lea.hbm %s3603_s4, 1024 }
  0x4a   : > { %s349_s28 = sshll.u32 %s3081_s18, 4  ;;  %p2914_p6 = scmp.ne.s32.totalorder %s3603_s4, %s2913_s26  ;;  %s350_s28 = int_to_ptr.vmem [resolvable:$true] %s349_s28 }
  0x4b   : > { %p2920_p5 = scmp.lt.u32.totalorder %s2913_s26, %s3603_s4 }
  0x4c   : > { %p2916_p10 = pnand %p2914_p6, %p3227_p13 }
  0x4e   : > { %p2917_p3 = pneg %p2916_p10 }
  0x50   : > { %p2922_p7 = pnand %p2920_p5, %p2917_p3 }
  0x52   : > { %2925 = shalt.err (!%p2922_p7)
}
  0x53   : > { %s2926_s16 = scalar_lea.vmem %s350_s28, 1024  ;;  %p2934_p2 = scmp.lt.s32.totalorder %s350_s28, %s350_s28 }
  0x54   : > { %p2927_p9 = scmp.ne.s32.totalorder %s350_s28, %s2926_s16  ;;  %p2935_p1 = scmp.lt.s32.totalorder %s2926_s16, %s2926_s16 }
  0x56   : > { %p2929_p12 = pnand %p2927_p9, %p3227_p13  ;;  %p2936_p4 = por %p2935_p1, %p2934_p2 }
  0x58   : > { %p2930_p0 = pneg %p2929_p12 }
  0x5a   : > { %p2937_p8 = pnand %p2936_p4, %p2930_p0 }
  0x5c   : > { %2940 = shalt.err (!%p2937_p8)
}
  0x5d   : > { %s3082_s11 = smov 64   ;;  %s3083_s9 = smov 4  }
  0x5e   : > { %2603 = dma.hbm_to_vmem [thread:$0]  (!%p3213_p11), %s3603_s4, 1024, %s350_s28, [#allocation7], %s3082_s11, %s3082_s11, %s3083_s9  }
  0x5f   : > { %s3084_s21 = smov [#allocation11]   ;;  %s2941_s26 = scalar_lea.hbm %s3609_s10, 4096 }
  0x60   : > { %s387_s18 = sshll.u32 %s3084_s21, 4  ;;  %p2942_p4 = scmp.ne.s32.totalorder %s3609_s10, %s2941_s26  ;;  %s388_s18 = int_to_ptr.vmem [resolvable:$true] %s387_s18 }
  0x61   : > { %p2948_p10 = scmp.lt.u32.totalorder %s2941_s26, %s3609_s10 }
  0x62   : > { %p2944_p8 = pnand %p2942_p4, %p3227_p13 }
  0x64   : > { %p2945_p6 = pneg %p2944_p8 }
  0x66   : > { %p2950_p3 = pnand %p2948_p10, %p2945_p6 }
  0x68   : > { %2953 = shalt.err (!%p2950_p3)
}
  0x69   : > { %s2954_s28 = scalar_lea.vmem %s388_s18, 4096  ;;  %p2962_p12 = scmp.lt.s32.totalorder %s388_s18, %s388_s18 }
  0x6a   : > { %p2955_p5 = scmp.ne.s32.totalorder %s388_s18, %s2954_s28  ;;  %p2963_p0 = scmp.lt.s32.totalorder %s2954_s28, %s2954_s28 }
  0x6c   : > { %p2957_p7 = pnand %p2955_p5, %p3227_p13  ;;  %p2964_p2 = por %p2963_p0, %p2962_p12 }
  0x6e   : > { %p2958_p9 = pneg %p2957_p7 }
  0x70   : > { %p2965_p1 = pnand %p2964_p2, %p2958_p9 }
  0x72   : > { %2968 = shalt.err (!%p2965_p1)
}
  0x73   : > { %2609 = dma.hbm_to_vmem [thread:$0]  (!%p3213_p11), %s3609_s10, 4096, %s388_s18, [#allocation10], %s3082_s11, %s3082_s11, %s3083_s9  }
  0x74   : > { %s3308_s30 = sadd.s32 1, %s3073_s24   ;;  %s37_s21 = sadd.s32 1, %s3069_s23 }
  0x75   : > { %s34_s14 = ssub.s32 %s3073_s24, %s3308_s30  ;;  %p44_p13 = scmp.ne.s32.totalorder %s3069_s23, %s3065_s22 }
  0x76   : > { %p35_p4 = scmp.eq.s32.totalorder %s34_s14, 0  ;;  %p45_p8 = scmp.eq.s32.totalorder %s3073_s24, 0 }
  0x77   : > { %p3630_p6 = scmp.eq.s32.totalorder %s3183_s25, 1  ;;  %p2622_p3 = scmp.lt.s32.totalorder %s3073_s24, 2 }
  0x78   : > { %s3324_s20 = scalar_select %p35_p4, %s3069_s23, %s37_s21  }
  0x79   : > { %p3318_p10 = por %p3630_p6, %p44_p13  ;;  %p46_p5 = por %p45_p8, %p44_p13 }
  0x7a   : > { %s404_s26 = sand.u32 1, %s3069_s23   ;;  %s2409_s11 = sshll.u32 %s3073_s24, 8 }
  0x7b   : > { %s2284_s15 = sshll.u32 %s404_s26, 4  ;;  %s3331_s17 = scalar_lea.hbm %s3599_s0, %s2409_s11 }
  0x7c   : > { %s408_s13 = scalar_lea.vmem [#allocation3], %s2284_s15  ;;  %p3335_p11 = pnand %p2622_p3, %p46_p5 }
  0x7d   : > { %s415_s16 = sshll.u32 %s408_s13, 4  ;;  %s3339_s3 = scalar_lea.sflag [#allocation4], %s404_s26  ;;  %s3333_s16 = int_to_ptr.vmem [resolvable:$true] %s415_s16 }
  0x7e   : > { %s2969_s12 = scalar_lea.hbm %s3331_s17, 256  ;;  %p2971_p9 = pneg %p3335_p11 }
  0x7f   : > { %p2970_p7 = scmp.ne.s32.totalorder %s3331_s17, %s2969_s12  ;;  %s2974_s15 = scalar_lea.hbm %s3599_s0, 512 }
  0x80   : > { %p2975_p2 = scmp.lt.u32.totalorder %s3331_s17, %s3599_s0  ;;  %p2976_p1 = scmp.lt.u32.totalorder %s2974_s15, %s2969_s12 }
  0x81   : > { %p2972_p12 = pnand %p2971_p9, %p2970_p7  ;;  %p2978_p4 = scmp.lt.u32.totalorder %s2969_s12, %s3331_s17 }
  0x82   : > { %p2977_p13 = por %p2976_p1, %p2975_p2 }
  0x83   : > { %p2973_p0 = pneg %p2972_p12 }
  0x84   : > { %p2979_p8 = por %p2978_p4, %p2977_p13 }
  0x86   : > { %p2980_p6 = pnand %p2979_p8, %p2973_p0 }
  0x88   : > { %2983 = shalt.err (!%p2980_p6)
}
  0x89   : > { %s2984_s26 = scalar_lea.vmem %s3333_s16, 256  ;;  %s3085_s18 = smov [#allocation3]  }
  0x8a   : > { %p2985_p3 = scmp.ne.s32.totalorder %s3333_s16, %s2984_s26  ;;  %s2989_s13 = sshll.u32 %s3085_s18, 4  ;;  %s2990_s13 = int_to_ptr.vmem [resolvable:$false] %s2989_s13 }
  0x8b   : > { %s2991_s21 = scalar_lea.vmem %s2990_s13, 512  ;;  %p2992_p12 = scmp.lt.s32.totalorder %s3333_s16, %s2990_s13 }
  0x8c   : > { %p2987_p5 = pnand %p2985_p3, %p2971_p9  ;;  %p2993_p2 = scmp.lt.s32.totalorder %s2991_s21, %s2984_s26 }
  0x8e   : > { %p2988_p7 = pneg %p2987_p5  ;;  %p2994_p1 = por %p2993_p2, %p2992_p12 }
  0x90   : > { %p2995_p13 = pnand %p2994_p1, %p2988_p7 }
  0x92   : > { %2998 = shalt.err (!%p2995_p13)
}
  0x93   : > { %s3086_s12 = smov 128   ;;  %s3087_s14 = smov 8  }
  0x94   : > { %2613 = dma.hbm_to_vmem [thread:$0]  (!%p3335_p11), %s3331_s17, 256, %s3333_s16, %s3339_s3, %s3086_s12, %s3086_s12, %s3087_s14  }
  0x95   : > { %p3633_p9 = scmp.ne.s32.totalorder %s3626_s29, 0 }
  0x96   : > { %s3370_s15 = sand.u32 (!%p3633_p9), 1, %s3065_s22   ;;  %p3634_p0 = scmp.ne.s32.totalorder (!%p3633_p9), %s3623_s27, 0 }
  0x97   : > { %427 = sbr.rel (%p3633_p9) target bundleno = 3158 (0xc56), region = 68  ;;  %s2288_s11 = sshll.u32 (!%p3633_p9), %s3370_s15, 4 }
  0x98   : > { %s430_s9 = scalar_lea.sflag (!%p3633_p9), [#allocation4], %s3370_s15  ;;  %s3376_s26 = scalar_lea.vmem (!%p3633_p9), [#allocation3], %s2288_s11 }
  0x9e   : > { %3044 = dma.done.wait (%p3634_p0), %s430_s9, 256  }
  0x9f   : > { %3046 = vsyncadd (%p3634_p0), %s430_s9, 4294967040  ;;  %p3635_p11 = scmp.eq.s32.totalorder %s3183_s25, 0 }
  0xa1   : > { %3048 = dma.done.wait (%p3635_p11), [#allocation7], 4096   ;;  %p3636_p4 = pmov %p3635_p11 }
  0xa3   : > { %3050 = vsyncadd (%p3636_p4), [#allocation7], 4294963200  ;;  %p3637_p8 = pmov %p3636_p4 }
  0xa4   : > { %p3638_p6 = pmov %p3636_p4 }
  0xa5   : > { %3052 = dma.done.wait (%p3637_p8), [#allocation10], 8192  }
  0xa6   : > { %3054 = vsyncadd (%p3638_p6), [#allocation10], 4294959104  ;;  %v3391_v0 = vld [vmem:[%s3376_s26] sm:$0xff]  ;;  %v492_v1 = vld [vmem:[%s3376_s26 + $0x8] sm:$0xff]  ;;  %v3088_v4 = vmov 0.0   ;;  %v3089_v30 = vmov 0  }
  0xa7   : > { %495 = vadd.xlane.f32.xlu0 %v3391_v0  ;;  %v2680_v2 = vld [vmem:[#allocation6 + $0x4] ss:$12 sps:$4 sm:$0xff]   ;;  %v2682_v3 = vld [vmem:[#allocation6] ss:$12 sps:$4 sm:$0xff]   ;;  %2489 = vmatprep.subr.bf16.mxu1 %v3088_v4  ;;  %v2683_v5 = vld [vmem:[#allocation6 + $0x8] ss:$12 sps:$4 sm:$0xff]  }
  0xa8   : > { %v2684_v6 = vld [vmem:[#allocation6 + $0x1c] ss:$12 sps:$4 sm:$0xff]   ;;  %695 = vmatprep.subr.bf16.mxu0 %v2680_v2  ;;  %2490 = vmatpush3.bf16.msra.mxu1 %v2683_v5  ;;  %v2686_v15 = vld [vmem:[#allocation6 + $0x18] ss:$12 sps:$4 sm:$0xff]   ;;  %v2687_v16 = vld [vmem:[#allocation6 + $0x20] ss:$12 sps:$4 sm:$0xff]  }
  0xa9   : > { %696 = vmatpush1.bf16.msra.mxu0 %v2682_v3  ;;  %2491 = vmatprep.subr.bf16.mxu1 %v3088_v4  ;;  %v2688_v17 = vld [vmem:[#allocation6 + $0x34] ss:$12 sps:$4 sm:$0xff]   ;;  %v2690_v18 = vld [vmem:[#allocation6 + $0x30] ss:$12 sps:$4 sm:$0xff]   ;;  %v2691_v19 = vld [vmem:[#allocation6 + $0x38] ss:$12 sps:$4 sm:$0xff]  }
  0xaa   : > { %697 = vmatprep.subr.bf16.mxu0 %v2684_v6  ;;  %v2692_v20 = vld [vmem:[#allocation6 + $0x4c] ss:$12 sps:$4 sm:$0xff]   ;;  %v2694_v21 = vld [vmem:[#allocation6 + $0x48] ss:$12 sps:$4 sm:$0xff]   ;;  %v2695_v22 = vld [vmem:[#allocation6 + $0x50] ss:$12 sps:$4 sm:$0xff]   ;;  %727 = vmatprep.mubr.bf16.mxu0 %v3089_v30 }
  0xab   : > { %497 = vadd.xlane.f32.xlu0 %v492_v1  ;;  %v2696_v23 = vld [vmem:[#allocation6 + $0x64] ss:$12 sps:$4 sm:$0xff]   ;;  %v2698_v24 = vld [vmem:[#allocation6 + $0x60] ss:$12 sps:$4 sm:$0xff]   ;;  %v2699_v25 = vld [vmem:[#allocation6 + $0x68] ss:$12 sps:$4 sm:$0xff]  }
  0xac   : > { %2492 = vmatpush3.bf16.msra.mxu1 %v2687_v16  ;;  %v2700_v26 = vld [vmem:[#allocation6 + $0x7c] ss:$12 sps:$4 sm:$0xff]   ;;  %v2702_v27 = vld [vmem:[#allocation6 + $0x78] ss:$12 sps:$4 sm:$0xff]   ;;  %v2703_v28 = vld [vmem:[#allocation6 + $0x80] ss:$12 sps:$4 sm:$0xff]  }
  0xad   : > { %698 = vmatpush1.bf16.msra.mxu0 %v2686_v15  ;;  %2493 = vmatprep.subr.bf16.mxu1 %v3088_v4  ;;  %v2704_v29 = vld [vmem:[#allocation6 + $0x94] ss:$12 sps:$4 sm:$0xff]   ;;  %vm3090_vm0 = vmmov 0   ;;  %v2706_v31 = vld [vmem:[#allocation6 + $0x90] ss:$12 sps:$4 sm:$0xff]   ;;  %vm784_vm1 = vcmask 261120  }
  0xae   : > { %699 = vmatprep.subr.bf16.mxu0 %v2688_v17  ;;  %2505 = vmatprep.mubr.msk.bf16.mxu1 %vm3090_vm0, %v3088_v4  ;;  %v2707_v32 = vld [vmem:[#allocation6 + $0x98] ss:$12 sps:$4 sm:$0xff]   ;;  %v2710_v34 = vld [vmem:[#allocation6 + $0xa8] ss:$12 sps:$4 sm:$0xff]   ;;  %v2711_v35 = vld [vmem:[#allocation6 + $0xb0] ss:$12 sps:$4 sm:$0xff]  }
  0xaf   : > { %v2708_v33 = vld [vmem:[#allocation6 + $0xac] ss:$12 sps:$4 sm:$0xff]   ;;  %v2294_v44 = vld [vmem:[%s3600_s1] ss:$0 sm:$0xff]  ;;  %vm832_vm2 = vcmask 130048   ;;  %s3091_s28 = smov 96  }
  0xb0   : > { %2494 = vmatpush3.bf16.msra.mxu1 %v2691_v19  ;;  %v2295_v48 = vld [vmem:[%s3601_s2] ss:$0 sm:$0xff]  ;;  %s3092_s3 = smov 64   ;;  %s3093_s18 = smov 32   ;;  %vm1034_vm3 = vcmask 523520   ;;  %vm1166_vm4 = vcmask 785920  }
  0xb1   : > { %700 = vmatpush1.bf16.msra.mxu0 %v2690_v18  ;;  %2495 = vmatprep.subr.bf16.mxu1 %v3088_v4  ;;  %vm1298_vm5 = vcmask 1048320   ;;  %s3639_s17 = sld [smem:[#allocation20_spill]]  ;;  %s2410_s21 = sshll.u32 %s3183_s25, 8 }
  0xb2   : > { %701 = vmatprep.subr.bf16.mxu0 %v2692_v20  ;;  %s3641_s9 = sld [smem:[#allocation22_spill]]  ;;  %s3094_s25 = smov [#allocation12]  }
  0xb3   : > { %s3003_s29 = sshll.u32 %s3094_s25, 4  ;;  %s3004_s29 = int_to_ptr.vmem [resolvable:$false] %s3003_s29 }
  0xb4   : > { %2496 = vmatpush3.bf16.msra.mxu1 %v2695_v22 }
  0xb5   : > { %702 = vmatpush1.bf16.msra.mxu0 %v2694_v21  ;;  %2497 = vmatprep.subr.bf16.mxu1 %v3088_v4 }
  0xb6   : > { %703 = vmatprep.subr.bf16.mxu0 %v2696_v23 }
  0xb8   : > { %2498 = vmatpush3.bf16.msra.mxu1 %v2699_v25 }
  0xb9   : > { %704 = vmatpush1.bf16.msra.mxu0 %v2698_v24  ;;  %2499 = vmatprep.subr.bf16.mxu1 %v3088_v4 }
  0xba   : > { %705 = vmatprep.subr.bf16.mxu0 %v2700_v26 }
  0xbc   : > { %2500 = vmatpush3.bf16.msra.mxu1 %v2703_v28 }
  0xbd   : > { %706 = vmatpush1.bf16.msra.mxu0 %v2702_v27  ;;  %2501 = vmatprep.subr.bf16.mxu1 %v3088_v4 }
  0xbe   : > { %707 = vmatprep.subr.bf16.mxu0 %v2704_v29 }
  0xc0   : > { %2502 = vmatpush3.bf16.msra.mxu1 %v2707_v32 }
  0xc1   : > { %708 = vmatpush1.bf16.msra.mxu0 %v2706_v31  ;;  %2503 = vmatprep.subr.bf16.mxu1 %v3088_v4 }
  0xc2   : > { %709 = vmatprep.subr.bf16.mxu0 %v2708_v33 }
  0xc4   : > { %2504 = vmatpush3.bf16.msra.mxu1 %v2711_v35 }
  0xc5   : > { %710 = vmatpush1.bf16.msra.mxu0 %v2710_v34  ;;  %2509 = vmatprep.subr.bf16.mxu1 %v3088_v4 }
  0xc6   : > { %2533 = vmatprep.subr.bf16.mxu0 %v3088_v4 }
 0x134   : > { %v496_v7 = vpop.xlane.xlu0 %495 }
 0x135   : > { %v500_v8 = vmul.f32 0.0078125, %v496_v7 }
 0x137   : > { %v3398_v9 = vsub.f32 %v3391_v0, %v500_v8 }
 0x138   : > { %v498_v10 = vpop.xlane.xlu0 %497 }
 0x139   : > { %v501_v11 = vmul.f32 0.0078125, %v498_v10  ;;  %v504_v12 = vmul.f32 %v3398_v9, %v3398_v9 }
 0x13b   : > { %v3402_v13 = vsub.f32 %v492_v1, %v501_v11  ;;  %506 = vadd.xlane.f32.xlu1 %v504_v12 }
 0x13d   : > { %v505_v14 = vmul.f32 %v3402_v13, %v3402_v13 }
 0x13f   : > { %508 = vadd.xlane.f32.xlu1 %v505_v14 }
 0x1c8   : > { %v507_v36 = vpop.xlane.xlu1 %506 }
 0x1c9   : > { %v510_v37 = vmul.f32 0.0078125, %v507_v36 }
 0x1cb   : > { %v512_v38 = vadd.f32 1e-05, %v510_v37 }
 0x1cc   : > { %v509_v39 = vpop.xlane.xlu1 %508 }
 0x1cd   : > { %2800 = vrsqrt.f32 %v512_v38  ;;  %v511_v40 = vmul.f32 0.0078125, %v509_v39 }
 0x1cf   : > { %v513_v41 = vadd.f32 1e-05, %v511_v40 }
 0x1d1   : > { %2802 = vrsqrt.f32 %v513_v41 }
 0x1d7   : > { %v2801_v42 = vpop.eup %2800 }
 0x1d8   : > { %v516_v43 = vmul.f32 %v2801_v42, %v3398_v9 }
 0x1da   : > { %v524_v47 = vmul.f32 %v2294_v44, %v516_v43 }
 0x1db   : > { %v2803_v45 = vpop.eup %2802 }
 0x1dc   : > { %v517_v46 = vmul.f32 %v2803_v45, %v3402_v13  ;;  %v532_v50 = vadd.f32 %v2295_v48, %v524_v47 }
 0x1de   : > { %v525_v49 = vmul.f32 %v2294_v44, %v517_v46 }
 0x1e0   : > { %v533_v51 = vadd.f32 %v2295_v48, %v525_v49 }
 0x1e2   : > { %v534_v52 = vpack.c.bf16 %v533_v51, %v532_v50 }
 0x1e4   : > { %728 = vmatmul.mubr.bf16.vlgmr.msra.gmra.mrb[0].mxu0 %v534_v52  ;;  %2506 = vmatmul.mubr.bf16.vlgmr.msra.gmra.mrb[0].mxu1 %v534_v52 }
 0x1e5   : > { %2511 = vmatprep.mubr.msk.bf16.mxu1 %vm3090_vm0, %v3088_v4  ;;  %2535 = vmatprep.mubr.msk.bf16.mxu0 %vm3090_vm0, %v3088_v4 }
 0x2b7   : > { %v729_v53 = vpop.f32.mrb[0].mxu0  ;;  %v772_v54 = vpop.f32.mrb[0].mxu1 }
 0x2b8   : > { %v731_v55 = vpop.f32.mrb[1].mxu0  ;;  %v2507_v56 = vpop.f32.mrb[1].mxu1  ;;  %v779_v59 = vmul.f32 0.17677669, %v729_v53 }
 0x2b9   : > { %v733_v57 = vpop.f32.mrb[2].mxu0  ;;  %v775_v58 = vpop.f32.mrb[2].mxu1 }
 0x2ba   : > { %v780_v60 = vmul.f32 0.17677669, %v733_v57  ;;  %v3429_v61 = vpack.c.bf16 %v775_v58, %v772_v54  ;;  %v735_v62 = vpop.f32.mrb[3].mxu0  ;;  %v2508_v63 = vpop.f32.mrb[3].mxu1 }
 0x2bb   : > { %v782_v1 = vpack.c.bf16 %v735_v62, %v731_v55 }
 0x2bc   : > { %v781_v2 = vpack.c.bf16 %v780_v60, %v779_v59 }
 0x2bd   : > { %v789_v3 = vsel %vm784_vm1, %v782_v1, 0 }
 0x2be   : > { %2510 = vmatpush3.bf16.xpose.msra.mxu1 %v789_v3 }
 0x2bf   : > { %2515 = vmatprep.subr.bf16.mxu1 %v3088_v4 }
 0x2c5   : > { %2512 = vmatmul.mubr.msk.bf16.vlgmr.msra.gmra.mrb[4].mxu1 %vm784_vm1, %v781_v2 }
 0x2c6   : > { %2516 = vmatpush3.bf16.msra.mxu1 %v3429_v61  ;;  %2517 = vmatprep.mubr.msk.bf16.mxu1 %vm3090_vm0, %v3088_v4 }
 0x2c7   : > { %2521 = vmatprep.subr.bf16.mxu1 %v3088_v4 }
 0x398   : > { %v825_v5 = vpop.f32.mrb[4].mxu1 }
 0x399   : > { %v2513_v6 = vpop.f32.mrb[5].mxu1  ;;  %v833_v7 = vsel %vm832_vm2, %v825_v5, -inf }
 0x39a   : > { %834 = vmax.xlane.f32.xlu0 %v833_v7  ;;  %v828_v8 = vpop.f32.mrb[6].mxu1 }
 0x39b   : > { %v2514_v9 = vpop.f32.mrb[7].mxu1  ;;  %v836_v10 = vsel %vm832_vm2, %v828_v8, -inf }
 0x39c   : > { %837 = vmax.xlane.f32.xlu1 %v836_v10 }
 0x427   : > { %v835_v11 = vpop.xlane.xlu0 %834 }
 0x428   : > { %v839_v12 = vsub.f32 %v825_v5, %v835_v11 }
 0x429   : > { %v838_v13 = vpop.xlane.xlu1 %837 }
 0x42a   : > { %v841_v14 = vmul.f32 1.442695, %v839_v12  ;;  %v840_v15 = vsub.f32 %v828_v8, %v838_v13 }
 0x42c   : > { %2804 = vpow2.f32 %v841_v14  ;;  %v843_v16 = vmul.f32 1.442695, %v840_v15 }
 0x42e   : > { %2806 = vpow2.f32 %v843_v16 }
 0x436   : > { %v2805_v17 = vpop.eup %2804 }
 0x437   : > { %v845_v18 = vsel %vm832_vm2, %v2805_v17, 0.0 }
 0x438   : > { %v2807_v19 = vpop.eup %2806  ;;  %846 = vadd.xlane.f32.xlu0 %v845_v18 }
 0x439   : > { %v848_v20 = vsel %vm832_vm2, %v2807_v19, 0.0 }
 0x43a   : > { %849 = vadd.xlane.f32.xlu1 %v848_v20 }
 0x44b   : > { %903 = vrot.lane.b32.xlu1 %v781_v2, %s3091_s28 }
 0x44e   : > { %906 = vrot.lane.b32.xlu0 %v782_v1, %s3091_s28 }
 0x44f   : > { %1039 = vrot.lane.b32.xlu1 %v782_v1, %s3092_s3 }
 0x452   : > { %1171 = vrot.lane.b32.xlu0 %v782_v1, %s3093_s18 }
 0x453   : > { %1037 = vrot.lane.b32.xlu1 %v781_v2, %s3092_s3 }
 0x457   : > { %1169 = vrot.lane.b32.xlu1 %v781_v2, %s3093_s18 }
 0x4c5   : > { %v847_v21 = vpop.xlane.xlu0 %846 }
 0x4c6   : > { %2808 = vrcp.f32 %v847_v21 }
 0x4c7   : > { %v850_v22 = vpop.xlane.xlu1 %849 }
 0x4c8   : > { %2810 = vrcp.f32 %v850_v22 }
 0x4c9   : > { %v907_v24 = vpop.permute.xlu0 %906 }
 0x4ca   : > { %v912_v34 = vsel %vm784_vm1, %v907_v24, 0 }
 0x4cb   : > { %v904_v23 = vpop.permute.xlu1 %903 }
 0x4cd   : > { %v1172_v32 = vpop.permute.xlu0 %1171 }
 0x4ce   : > { %v1177_v36 = vsel %vm784_vm1, %v1172_v32, 0 }
 0x4cf   : > { %v1040_v25 = vpop.permute.xlu1 %1039 }
 0x4d0   : > { %v2809_v26 = vpop.eup %2808  ;;  %v1045_v27 = vsel %vm784_vm1, %v1040_v25, 0 }
 0x4d1   : > { %2534 = vmatpush3.bf16.xpose.msra.mxu0 %v1045_v27  ;;  %v853_v29 = vmul.f32 %v2809_v26, %v2805_v17 }
 0x4d2   : > { %v2811_v28 = vpop.eup %2810  ;;  %2545 = vmatprep.subr.bf16.mxu0 %v3088_v4 }
 0x4d3   : > { %v854_v31 = vmul.f32 %v2811_v28, %v2807_v19  ;;  %v1038_v35 = vpop.permute.xlu1 %1037 }
 0x4d5   : > { %v855_v33 = vpack.c.bf16 %v854_v31, %v853_v29 }
 0x4d7   : > { %2518 = vmatmul.mubr.msk.bf16.vlgmr.msra.gmra.mrb[8].mxu1 %vm832_vm2, %v855_v33  ;;  %v1170_v37 = vpop.permute.xlu1 %1169 }
 0x4d8   : > { %2522 = vmatpush3.bf16.xpose.msra.mxu1 %v912_v34  ;;  %2536 = vmatmul.mubr.msk.bf16.vlgmr.msra.gmra.mrb[4].mxu0 %vm784_vm1, %v1038_v35 }
 0x4d9   : > { %2546 = vmatpush3.bf16.xpose.msra.mxu0 %v1177_v36  ;;  %2523 = vmatprep.mubr.msk.bf16.mxu1 %vm3090_vm0, %v3088_v4 }
 0x4da   : > { %2547 = vmatprep.mubr.msk.bf16.mxu0 %vm3090_vm0, %v3088_v4  ;;  %2527 = vmatprep.subr.bf16.mxu1 %v3088_v4 }
 0x4db   : > { %2557 = vmatprep.subr.bf16.mxu0 %v3088_v4 }
 0x4df   : > { %2524 = vmatmul.mubr.msk.bf16.vlgmr.msra.gmra.mrb[12].mxu1 %vm784_vm1, %v904_v23 }
 0x4e0   : > { %2548 = vmatmul.mubr.msk.bf16.vlgmr.msra.gmra.mrb[8].mxu0 %vm784_vm1, %v1170_v37  ;;  %2529 = vmatprep.mubr.msk.bf16.mxu1 %vm3090_vm0, %v3088_v4 }
 0x4e1   : > { %2573 = vmatprep.mubr.msk.bf16.mxu0 %vm3090_vm0, %v3088_v4 }
 0x5aa   : > { %v893_v38 = vpop.f32.mrb[8].mxu1 }
 0x5ab   : > { %900 = vst.msk [vmem:[#allocation2] sm:$0xff] %vm784_vm1, %v893_v38  ;;  %v2519_v39 = vpop.f32.mrb[9].mxu1  ;;  %v1081_v40 = vpop.f32.mrb[4].mxu0 }
 0x5ac   : > { %v896_v41 = vpop.f32.mrb[10].mxu1  ;;  %v2537_v42 = vpop.f32.mrb[5].mxu0  ;;  %v1088_v56 = vsel %vm832_vm2, %v1081_v40, -inf }
 0x5ad   : > { %901 = vst.msk [vmem:[#allocation2 + $0x8] sm:$0xff] %vm784_vm1, %v896_v41  ;;  %v2520_v43 = vpop.f32.mrb[11].mxu1  ;;  %v1084_v44 = vpop.f32.mrb[6].mxu0 }
 0x5ae   : > { %v2538_v45 = vpop.f32.mrb[7].mxu0  ;;  %v1091_v58 = vsel %vm832_vm2, %v1084_v44, -inf }
 0x5b2   : > { %v948_v46 = vpop.f32.mrb[12].mxu1 }
 0x5b3   : > { %v2525_v47 = vpop.f32.mrb[13].mxu1  ;;  %v1213_v48 = vpop.f32.mrb[8].mxu0  ;;  %v955_v49 = vsel %vm832_vm2, %v948_v46, -inf }
 0x5b4   : > { %v2549_v50 = vpop.f32.mrb[9].mxu0  ;;  %956 = vmax.xlane.f32.xlu0 %v955_v49  ;;  %v951_v51 = vpop.f32.mrb[14].mxu1  ;;  %v1220_v59 = vsel %vm832_vm2, %v1213_v48, -inf }
 0x5b5   : > { %v2526_v52 = vpop.f32.mrb[15].mxu1  ;;  %v1216_v53 = vpop.f32.mrb[10].mxu0  ;;  %v958_v54 = vsel %vm832_vm2, %v951_v51, -inf }
 0x5b6   : > { %v2550_v55 = vpop.f32.mrb[11].mxu0  ;;  %959 = vmax.xlane.f32.xlu1 %v958_v54  ;;  %v1223_v57 = vsel %vm832_vm2, %v1216_v53, -inf  ;;  %v2713_v54 = vld [vmem:[#allocation8 + $0x8] sm:$0xff]  }
 0x5b7   : > { %v2714_v55 = vld [vmem:[#allocation8 + $0x10] sm:$0xff]  }
 0x5b8   : > { %1089 = vmax.xlane.f32.xlu0 %v1088_v56  ;;  %v2715_v56 = vld [vmem:[#allocation8 + $0x18] sm:$0xff]  }
 0x5ba   : > { %1224 = vmax.xlane.f32.xlu1 %v1223_v57  ;;  %v2716_v57 = vld [vmem:[#allocation8 + $0x20] sm:$0xff]  }
 0x5bc   : > { %1092 = vmax.xlane.f32.xlu0 %v1091_v58 }
 0x5c0   : > { %1221 = vmax.xlane.f32.xlu0 %v1220_v59 }
 0x641   : > { %v957_v60 = vpop.xlane.xlu0 %956 }
 0x642   : > { %v961_v8 = vsub.f32 %v948_v46, %v957_v60 }
 0x643   : > { %v960_v62 = vpop.xlane.xlu1 %959 }
 0x644   : > { %v962_v9 = vsub.f32 %v951_v51, %v960_v62  ;;  %v963_v14 = vmul.f32 1.442695, %v961_v8 }
 0x645   : > { %v1090_v63 = vpop.xlane.xlu0 %1089 }
 0x646   : > { %v1094_v1 = vsub.f32 %v1081_v40, %v1090_v63  ;;  %v965_v15 = vmul.f32 1.442695, %v962_v9  ;;  %v2717_v63 = vld [vmem:[#allocation8 + $0x28] sm:$0xff]  }
 0x647   : > { %v1225_v2 = vpop.xlane.xlu1 %1224 }
 0x648   : > { %v1096_v3 = vmul.f32 1.442695, %v1094_v1  ;;  %v1227_v5 = vsub.f32 %v1216_v53, %v1225_v2  ;;  %v2712_v53 = vld [vmem:[#allocation8] sm:$0xff]   ;;  %v2718_v1 = vld [vmem:[#allocation8 + $0x30] sm:$0xff]  }
 0x649   : > { %v1093_v6 = vpop.xlane.xlu0 %1092  ;;  %2558 = vmatpush3.bf16.msra.mxu0 %v2712_v53  ;;  %v2749_v53 = vld [vmem:[#allocation9 + $0x8c] ss:$16 sps:$4 sm:$0xff]  }
 0x64a   : > { %2812 = vpow2.f32 %v1096_v3  ;;  %v1095_v7 = vsub.f32 %v1084_v44, %v1093_v6  ;;  %v1230_v10 = vmul.f32 1.442695, %v1227_v5  ;;  %2559 = vmatprep.subr.bf16.mxu0 %v3088_v4  ;;  %v2719_v6 = vld [vmem:[#allocation8 + $0x38] sm:$0xff]  }
 0x64c   : > { %v1098_v11 = vmul.f32 1.442695, %v1095_v7 }
 0x64d   : > { %v1222_v12 = vpop.xlane.xlu0 %1221  ;;  %2560 = vmatpush3.bf16.msra.mxu0 %v2713_v54  ;;  %v2744_v54 = vld [vmem:[#allocation9 + $0x80] ss:$16 sps:$4 sm:$0xff]  }
 0x64e   : > { %2814 = vpow2.f32 %v1098_v11  ;;  %v1226_v13 = vsub.f32 %v1213_v48, %v1222_v12  ;;  %2561 = vmatprep.subr.bf16.mxu0 %v3088_v4 }
 0x64f   : > { %2816 = vpow2.f32 %v1230_v10 }
 0x650   : > { %v1228_v16 = vmul.f32 1.442695, %v1226_v13 }
 0x651   : > { %2562 = vmatpush3.bf16.msra.mxu0 %v2714_v55  ;;  %v2747_v55 = vld [vmem:[#allocation9 + $0x88] ss:$16 sps:$4 sm:$0xff]  }
 0x652   : > { %2818 = vpow2.f32 %v1228_v16  ;;  %2563 = vmatprep.subr.bf16.mxu0 %v3088_v4 }
 0x653   : > { %2820 = vpow2.f32 %v963_v14 }
 0x654   : > { %v2813_v17 = vpop.eup %2812  ;;  %2822 = vpow2.f32 %v965_v15 }
 0x655   : > { %v1100_v18 = vsel %vm832_vm2, %v2813_v17, 0.0  ;;  %2564 = vmatpush3.bf16.msra.mxu0 %v2715_v56  ;;  %v2752_v56 = vld [vmem:[#allocation9 + $0xa4] ss:$16 sps:$4 sm:$0xff]  }
 0x656   : > { %1101 = vadd.xlane.f32.xlu0 %v1100_v18  ;;  %2565 = vmatprep.subr.bf16.mxu0 %v3088_v4 }
 0x658   : > { %v2815_v19 = vpop.eup %2814 }
 0x659   : > { %v1103_v20 = vsel %vm832_vm2, %v2815_v19, 0.0  ;;  %v2817_v21 = vpop.eup %2816  ;;  %2566 = vmatpush3.bf16.msra.mxu0 %v2716_v57  ;;  %v2755_v57 = vld [vmem:[#allocation9 + $0xac] ss:$16 sps:$4 sm:$0xff]  }
 0x65a   : > { %1104 = vadd.xlane.f32.xlu1 %v1103_v20  ;;  %v1235_v25 = vsel %vm832_vm2, %v2817_v21, 0.0  ;;  %2567 = vmatprep.subr.bf16.mxu0 %v3088_v4  ;;  %v2328_v20 = vld [vmem:[%s3604_s5] ss:$0 sm:$0xff] }
 0x65c   : > { %v2819_v22 = vpop.eup %2818 }
 0x65d   : > { %v2821_v23 = vpop.eup %2820  ;;  %v1232_v24 = vsel %vm832_vm2, %v2819_v22, 0.0  ;;  %2568 = vmatpush3.bf16.msra.mxu0 %v2717_v63  ;;  %v2756_v63 = vld [vmem:[#allocation9 + $0xc0] ss:$16 sps:$4 sm:$0xff]  }
 0x65e   : > { %v2823_v26 = vpop.eup %2822  ;;  %1233 = vadd.xlane.f32.xlu0 %v1232_v24  ;;  %1236 = vadd.xlane.f32.xlu1 %v1235_v25  ;;  %v967_v27 = vsel %vm832_vm2, %v2821_v23, 0.0 }
 0x65f   : > { %v970_v28 = vsel %vm832_vm2, %v2823_v26, 0.0  ;;  %2569 = vmatprep.subr.bf16.mxu0 %v3088_v4 }
 0x661   : > { %2570 = vmatpush3.bf16.msra.mxu0 %v2718_v1  ;;  %v2759_v1 = vld [vmem:[#allocation9 + $0xc8] ss:$16 sps:$4 sm:$0xff]  }
 0x662   : > { %968 = vadd.xlane.f32.xlu0 %v967_v27  ;;  %971 = vadd.xlane.f32.xlu1 %v970_v28  ;;  %v2856_v28 = vld [vmem:[%s3376_s26 + $0x8] sm:$0xff]  ;;  %s3554_s26 = scalar_lea.hbm %s3641_s9, %s2410_s21 }
 0x663   : > { %2571 = vmatprep.subr.bf16.mxu0 %v3088_v4 }
 0x665   : > { %2572 = vmatpush3.bf16.msra.mxu0 %v2719_v6  ;;  %v2765_v6 = vld [vmem:[#allocation9 + $0xe8] ss:$16 sps:$4 sm:$0xff]  }
 0x673   : > { %1111 = vrot.lane.b32.xlu1 %v3429_v61, %s3092_s3 }
 0x677   : > { %1243 = vrot.lane.b32.xlu1 %v3429_v61, %s3093_s18 }
 0x678   : > { %979 = vrot.lane.b32.xlu0 %v3429_v61, %s3091_s28 }
 0x6e3   : > { %v1102_v29 = vpop.xlane.xlu0 %1101 }
 0x6e7   : > { %v1105_v31 = vpop.xlane.xlu1 %1104 }
 0x6eb   : > { %v1234_v32 = vpop.xlane.xlu0 %1233  ;;  %v1237_v33 = vpop.xlane.xlu1 %1236 }
 0x6ef   : > { %v969_v34 = vpop.xlane.xlu0 %968  ;;  %v972_v35 = vpop.xlane.xlu1 %971 }
 0x6f0   : > { %2824 = vrcp.f32 %v969_v34  ;;  %v2728_v34 = vld [vmem:[#allocation9 + $0x24] ss:$16 sps:$4 sm:$0xff]  }
 0x6f1   : > { %2826 = vrcp.f32 %v972_v35  ;;  %v2731_v35 = vld [vmem:[#allocation9 + $0x2c] ss:$16 sps:$4 sm:$0xff]  }
 0x6f2   : > { %2828 = vrcp.f32 %v1105_v31  ;;  %v2722_v31 = vld [vmem:[#allocation9 + $0x4] ss:$16 sps:$4 sm:$0xff]  }
 0x6f3   : > { %v980_v36 = vpop.permute.xlu0 %979  ;;  %2830 = vrcp.f32 %v1102_v29  ;;  %v1112_v42 = vpop.permute.xlu1 %1111 }
 0x6f4   : > { %2528 = vmatpush3.bf16.msra.mxu1 %v980_v36  ;;  %2832 = vrcp.f32 %v1234_v32  ;;  %v2723_v32 = vld [vmem:[#allocation9 + $0x8] ss:$16 sps:$4 sm:$0xff]  }
 0x6f5   : > { %2539 = vmatprep.subr.bf16.mxu1 %v3088_v4  ;;  %2834 = vrcp.f32 %v1237_v33  ;;  %v2725_v33 = vld [vmem:[#allocation9 + $0xc] ss:$16 sps:$4 sm:$0xff]   ;;  %v2729_v36 = vld [vmem:[#allocation9 + $0x28] ss:$16 sps:$4 sm:$0xff]  }
 0x6f6   : > { %1716 = vmatprep.subr.bf16.mxu0 %v2725_v33  ;;  %v2776_v33 = vld [vmem:[#allocation11 + $0x50] sm:$0xff]  }
 0x6f7   : > { %v1244_v49 = vpop.permute.xlu1 %1243 }
 0x6fa   : > { %v2825_v37 = vpop.eup %2824 }
 0x6fb   : > { %v2827_v38 = vpop.eup %2826  ;;  %v975_v39 = vmul.f32 %v2825_v37, %v2821_v23 }
 0x6fc   : > { %v976_v40 = vmul.f32 %v2827_v38, %v2823_v26  ;;  %v2829_v41 = vpop.eup %2828 }
 0x6fd   : > { %v2831_v43 = vpop.eup %2830  ;;  %v1109_v44 = vmul.f32 %v2829_v41, %v2815_v19 }
 0x6fe   : > { %v977_v61 = vpack.c.bf16 %v976_v40, %v975_v39  ;;  %v1108_v45 = vmul.f32 %v2831_v43, %v2813_v17  ;;  %v2833_v46 = vpop.eup %2832 }
 0x6ff   : > { %v2835_v48 = vpop.eup %2834  ;;  %v1240_v50 = vmul.f32 %v2833_v46, %v2819_v22  ;;  %v2732_v46 = vld [vmem:[#allocation9 + $0x40] ss:$16 sps:$4 sm:$0xff]  }
 0x700   : > { %2530 = vmatmul.mubr.msk.bf16.vlgmr.msra.gmra.mrb[16].mxu1 %vm832_vm2, %v977_v61  ;;  %v1110_v47 = vpack.c.bf16 %v1109_v44, %v1108_v45  ;;  %v1241_v51 = vmul.f32 %v2835_v48, %v2817_v21  ;;  %v2734_v44 = vld [vmem:[#allocation9 + $0x44] ss:$16 sps:$4 sm:$0xff]   ;;  %v2737_v45 = vld [vmem:[#allocation9 + $0x4c] ss:$16 sps:$4 sm:$0xff]  }
 0x701   : > { %2540 = vmatpush3.bf16.msra.mxu1 %v1112_v42  ;;  %2541 = vmatprep.mubr.msk.bf16.mxu1 %vm3090_vm0, %v3088_v4  ;;  %v2740_v48 = vld [vmem:[#allocation9 + $0x64] ss:$16 sps:$4 sm:$0xff]  }
 0x702   : > { %2551 = vmatprep.subr.bf16.mxu1 %v3088_v4  ;;  %v1242_v52 = vpack.c.bf16 %v1241_v51, %v1240_v50  ;;  %v2738_v50 = vld [vmem:[#allocation9 + $0x60] ss:$16 sps:$4 sm:$0xff]   ;;  %v2741_v51 = vld [vmem:[#allocation9 + $0x68] ss:$16 sps:$4 sm:$0xff]  }
 0x708   : > { %2542 = vmatmul.mubr.msk.bf16.vlgmr.msra.gmra.mrb[20].mxu1 %vm832_vm2, %v1110_v47  ;;  %v2735_v47 = vld [vmem:[#allocation9 + $0x48] ss:$16 sps:$4 sm:$0xff]  }
 0x709   : > { %2552 = vmatpush3.bf16.msra.mxu1 %v1244_v49  ;;  %2553 = vmatprep.mubr.msk.bf16.mxu1 %vm3090_vm0, %v3088_v4  ;;  %v2743_v49 = vld [vmem:[#allocation9 + $0x6c] ss:$16 sps:$4 sm:$0xff]  }
 0x70a   : > { %1673 = vmatprep.subr.bf16.mxu1 %v2722_v31  ;;  %v2774_v31 = vld [vmem:[#allocation11 + $0x8] sm:$0xff]  }
 0x710   : > { %2554 = vmatmul.mubr.msk.bf16.vlgmr.msra.gmra.mrb[24].mxu1 %vm832_vm2, %v1242_v52  ;;  %v2746_v52 = vld [vmem:[#allocation9 + $0x84] ss:$16 sps:$4 sm:$0xff]  }
 0x711   : > { %1705 = vmatprep.mubr.bf16.mxu1 %v3089_v30 }
 0x7d3   : > { %v1019_v58 = vpop.f32.mrb[16].mxu1 }
 0x7d4   : > { %1028 = vrot.lane.b32.xlu1 %v1019_v58, %s3093_s18  ;;  %v2531_v59 = vpop.f32.mrb[17].mxu1  ;;  %v2750_v58 = vld [vmem:[#allocation9 + $0xa0] ss:$16 sps:$4 sm:$0xff]  }
 0x7d5   : > { %v1022_v60 = vpop.f32.mrb[18].mxu1  ;;  %v2753_v59 = vld [vmem:[#allocation9 + $0xa8] ss:$16 sps:$4 sm:$0xff]  }
 0x7d6   : > { %1030 = vrot.lane.b32.xlu0 %v1022_v60, %s3093_s18  ;;  %v2532_v62 = vpop.f32.mrb[19].mxu1  ;;  %v2758_v60 = vld [vmem:[#allocation9 + $0xc4] ss:$16 sps:$4 sm:$0xff]   ;;  %s489_s18 = scalar_lea.vmem [#allocation12], %s2288_s11  ;;  %s2153_s11 = scalar_lea.sflag [#allocation5], %s3370_s15 }
 0x7d7   : > { %v2761_v62 = vld [vmem:[#allocation9 + $0xcc] ss:$16 sps:$4 sm:$0xff]   ;;  %s2166_s13 = sshll.u32 %s489_s18, 4  ;;  %s3549_s13 = int_to_ptr.vmem [resolvable:$true] %s2166_s13 }
 0x7d8   : > { %s2999_s27 = scalar_lea.vmem %s3549_s13, 256  ;;  %p3006_p12 = scmp.lt.s32.totalorder %s3549_s13, %s3004_s29 }
 0x7d9   : > { %p3000_p3 = scmp.ne.s32.totalorder %s3549_s13, %s2999_s27 }
 0x7db   : > { %v1151_v2 = vpop.f32.mrb[20].mxu1  ;;  %p3001_p5 = pnand %p3000_p3, %p3318_p10 }
 0x7dc   : > { %1160 = vrot.lane.b32.xlu1 %v1151_v2, %s3092_s3  ;;  %v2543_v3 = vpop.f32.mrb[21].mxu1  ;;  %v2764_v2 = vld [vmem:[#allocation9 + $0xe4] ss:$16 sps:$4 sm:$0xff]  }
 0x7dd   : > { %v1154_v5 = vpop.f32.mrb[22].mxu1  ;;  %v2767_v3 = vld [vmem:[#allocation9 + $0xec] ss:$16 sps:$4 sm:$0xff]   ;;  %p3002_p7 = pneg %p3001_p5 }
 0x7de   : > { %1162 = vrot.lane.b32.xlu0 %v1154_v5, %s3092_s3  ;;  %v2544_v7 = vpop.f32.mrb[23].mxu1  ;;  %v2762_v5 = vld [vmem:[#allocation9 + $0xe0] ss:$16 sps:$4 sm:$0xff]   ;;  %s3640_s3 = sld [smem:[#allocation21_spill]] }
 0x7df   : > { %v2768_v7 = vld [vmem:[#allocation11 + $0x40] sm:$0xff]  }
 0x7e3   : > { %v1283_v8 = vpop.f32.mrb[24].mxu1 }
 0x7e4   : > { %1292 = vrot.lane.b32.xlu1 %v1283_v8, %s3091_s28  ;;  %v2555_v9 = vpop.f32.mrb[25].mxu1  ;;  %v2769_v8 = vld [vmem:[#allocation11 + $0xc0] sm:$0xff]  }
 0x7e5   : > { %v1286_v10 = vpop.f32.mrb[26].mxu1 }
 0x7e6   : > { %1294 = vrot.lane.b32.xlu0 %v1286_v10, %s3091_s28  ;;  %v2556_v11 = vpop.f32.mrb[27].mxu1 }
 0x846   : > { %v1029_v12 = vpop.permute.xlu1 %1028 }
 0x847   : > { %1035 = vst.msk [vmem:[#allocation2] sm:$0xff] %vm1034_vm3, %v1029_v12 }
 0x848   : > { %v1031_v13 = vpop.permute.xlu0 %1030 }
 0x849   : > { %1036 = vst.msk [vmem:[#allocation2 + $0x8] sm:$0xff] %vm1034_vm3, %v1031_v13 }
 0x84e   : > { %v1161_v14 = vpop.permute.xlu1 %1160 }
 0x84f   : > { %1167 = vst.msk [vmem:[#allocation2] sm:$0xff] %vm1166_vm4, %v1161_v14 }
 0x850   : > { %v1163_v15 = vpop.permute.xlu0 %1162 }
 0x851   : > { %1168 = vst.msk [vmem:[#allocation2 + $0x8] sm:$0xff] %vm1166_vm4, %v1163_v15 }
 0x856   : > { %v1293_v4 = vpop.permute.xlu1 %1292 }
 0x857   : > { %1299 = vst.msk [vmem:[#allocation2] sm:$0xff] %vm1298_vm5, %v1293_v4 }
 0x858   : > { %v1295_v16 = vpop.permute.xlu0 %1294 }
 0x859   : > { %1300 = vst.msk [vmem:[#allocation2 + $0x8] sm:$0xff] %vm1298_vm5, %v1295_v16  ;;  %v2337_v16 = vld [vmem:[%s3605_s6] ss:$0 sm:$0xff] }
 0x85e   : > { %v1301_v17 = vld [vmem:[#allocation2] sm:$0xff] }
 0x860   : > { %v1302_v18 = vld [vmem:[#allocation2 + $0x8] sm:$0xff] }
 0x861   : > { %v1303_v19 = vpack.c.bf16 %v1302_v18, %v1301_v17 }
 0x863   : > { %2574 = vmatmul.mubr.bf16.vlgmr.msra.gmra.mrb[12].mxu0 %v1303_v19 }
 0x864   : > { %1748 = vmatprep.mubr.bf16.mxu0 %v3089_v30  ;;  %v2720_v30 = vld [vmem:[#allocation9] ss:$16 sps:$4 sm:$0xff]   ;;  %1717 = vmatpush1.bf16.msra.mxu0 %v2723_v32  ;;  %v2775_v32 = vld [vmem:[#allocation11 + $0x88] sm:$0xff]  }
 0x865   : > { %1674 = vmatpush1.bf16.msra.mxu1 %v2720_v30  ;;  %1718 = vmatprep.subr.bf16.mxu0 %v2731_v35  ;;  %v2773_v30 = vld [vmem:[#allocation11 + $0xc8] sm:$0xff]   ;;  %v2778_v35 = vld [vmem:[#allocation11 + $0x10] sm:$0xff]  }
 0x866   : > { %1675 = vmatprep.subr.bf16.mxu1 %v2728_v34  ;;  %v2777_v34 = vld [vmem:[#allocation11 + $0xd0] sm:$0xff]  }
 0x868   : > { %1719 = vmatpush1.bf16.msra.mxu0 %v2729_v36  ;;  %v2780_v36 = vld [vmem:[#allocation11 + $0x58] sm:$0xff]  }
 0x869   : > { %1720 = vmatprep.subr.bf16.mxu0 %v2737_v45  ;;  %v2790_v45 = vld [vmem:[#allocation11 + $0x28] sm:$0xff]  }
 0x86c   : > { %1721 = vmatpush1.bf16.msra.mxu0 %v2735_v47  ;;  %v2792_v47 = vld [vmem:[#allocation11 + $0x70] sm:$0xff]  }
 0x86d   : > { %1722 = vmatprep.subr.bf16.mxu0 %v2743_v49  ;;  %v2794_v49 = vld [vmem:[#allocation11 + $0x30] sm:$0xff]  }
 0x870   : > { %1723 = vmatpush1.bf16.msra.mxu0 %v2741_v51  ;;  %v2796_v51 = vld [vmem:[#allocation11 + $0x78] sm:$0xff]  }
 0x871   : > { %1724 = vmatprep.subr.bf16.mxu0 %v2749_v53  ;;  %v2798_v53 = vld [vmem:[#allocation11 + $0x38] sm:$0xff]  }
 0x874   : > { %1725 = vmatpush1.bf16.msra.mxu0 %v2747_v55  ;;  %v1493_v55 = vlaneseq }
 0x875   : > { %1726 = vmatprep.subr.bf16.mxu0 %v2755_v57 }
 0x878   : > { %1727 = vmatpush1.bf16.msra.mxu0 %v2753_v59  ;;  %v1491_v59 = vld [vmem:[%s3639_s17] sm:$0xf]  ;;  %s3005_s17 = scalar_lea.vmem %s3004_s29, 512 }
 0x879   : > { %1728 = vmatprep.subr.bf16.mxu0 %v2761_v62  ;;  %p3007_p2 = scmp.lt.s32.totalorder %s3005_s17, %s2999_s27 }
 0x87b   : > { %p3008_p1 = por %p3007_p2, %p3006_p12 }
 0x87c   : > { %1729 = vmatpush1.bf16.msra.mxu0 %v2759_v1 }
 0x87d   : > { %1730 = vmatprep.subr.bf16.mxu0 %v2767_v3  ;;  %p3009_p13 = pnand %p3008_p1, %p3002_p7 }
 0x880   : > { %1731 = vmatpush1.bf16.msra.mxu0 %v2765_v6 }
 0x881   : > { %2467 = vmatprep.subr.bf16.mxu0 %v2769_v8 }
 0x936   : > { %v1409_v21 = vpop.f32.mrb[12].mxu0 }
 0x937   : > { %v1410_v22 = vadd.f32 %v2328_v20, %v1409_v21  ;;  %v2575_v23 = vpop.f32.mrb[13].mxu0 }
 0x938   : > { %v1412_v24 = vpop.f32.mrb[14].mxu0 }
 0x939   : > { %v3514_v25 = vadd.f32 %v1410_v22, %v3391_v0  ;;  %v1413_v26 = vadd.f32 %v2328_v20, %v1412_v24  ;;  %v2576_v27 = vpop.f32.mrb[15].mxu0  ;;  %v2726_v0 = vld [vmem:[#allocation9 + $0x20] ss:$16 sps:$4 sm:$0xff]  }
 0x93a   : > { %1676 = vmatpush1.bf16.msra.mxu1 %v2726_v0  ;;  %v2338_v20 = vld [vmem:[%s3606_s7] ss:$0 sm:$0xff]  ;;  %v2770_v24 = vld [vmem:[#allocation11] sm:$0xff]  }
 0x93b   : > { %v3517_v29 = vadd.f32 %v2856_v28, %v1413_v26  ;;  %1420 = vadd.xlane.f32.xlu1 %v3514_v25  ;;  %1677 = vmatprep.subr.bf16.mxu1 %v2734_v44  ;;  %v2771_v26 = vld [vmem:[#allocation11 + $0x80] sm:$0xff]   ;;  %v2772_v28 = vld [vmem:[#allocation11 + $0x48] sm:$0xff]   ;;  %v2779_v0 = vld [vmem:[#allocation11 + $0x90] sm:$0xff]  }
 0x93c   : > { %v2789_v44 = vld [vmem:[#allocation11 + $0xe8] sm:$0xff]  }
 0x93d   : > { %1422 = vadd.xlane.f32.xlu0 %v3517_v29 }
 0x93e   : > { %1678 = vmatpush1.bf16.msra.mxu1 %v2732_v46  ;;  %v2791_v46 = vld [vmem:[#allocation11 + $0xa8] sm:$0xff]  }
 0x93f   : > { %1679 = vmatprep.subr.bf16.mxu1 %v2740_v48  ;;  %v2793_v48 = vld [vmem:[#allocation11 + $0xf0] sm:$0xff]  }
 0x942   : > { %1680 = vmatpush1.bf16.msra.mxu1 %v2738_v50  ;;  %v2795_v50 = vld [vmem:[#allocation11 + $0xb0] sm:$0xff]  }
 0x943   : > { %1681 = vmatprep.subr.bf16.mxu1 %v2746_v52  ;;  %v2797_v52 = vld [vmem:[#allocation11 + $0xf8] sm:$0xff]  }
 0x946   : > { %1682 = vmatpush1.bf16.msra.mxu1 %v2744_v54  ;;  %v2799_v54 = vld [vmem:[#allocation11 + $0xb8] sm:$0xff]  }
 0x947   : > { %1683 = vmatprep.subr.bf16.mxu1 %v2752_v56  ;;  %v1494_v56 = vshrl.u32 %v1493_v55, 7 }
 0x949   : > { %v1495_v57 = vsub.s32 0, %v1494_v56  ;;  %v1507_v62 = vsub.s32 3, %v1494_v56 }
 0x94a   : > { %1684 = vmatpush1.bf16.msra.mxu1 %v2750_v58  ;;  %v1503_v58 = vsub.s32 2, %v1494_v56 }
 0x94b   : > { %1685 = vmatprep.subr.bf16.mxu1 %v2758_v60  ;;  %v1499_v60 = vsub.s32 1, %v1494_v56  ;;  %v1508_v3 = vrot.slane %v1491_v59, %v1507_v62 }
 0x94c   : > { %v1504_v1 = vrot.slane %v1491_v59, %v1503_v58 }
 0x94e   : > { %1686 = vmatpush1.bf16.msra.mxu1 %v2756_v63  ;;  %v1496_v63 = vrot.slane %v1491_v59, %v1495_v57 }
 0x94f   : > { %1687 = vmatprep.subr.bf16.mxu1 %v2764_v2  ;;  %v1500_v2 = vrot.slane %v1491_v59, %v1499_v60 }
 0x952   : > { %1688 = vmatpush1.bf16.msra.mxu1 %v2762_v5 }
 0x953   : > { %2445 = vmatprep.subr.bf16.mxu1 %v2768_v7 }
 0x9c8   : > { %v1421_v37 = vpop.xlane.xlu1 %1420 }
 0x9c9   : > { %v1424_v38 = vmul.f32 0.0078125, %v1421_v37  ;;  %v2781_v37 = vld [vmem:[#allocation11 + $0xd8] sm:$0xff]  }
 0x9ca   : > { %v1423_v39 = vpop.xlane.xlu0 %1422 }
 0x9cb   : > { %v3522_v40 = vsub.f32 %v3514_v25, %v1424_v38  ;;  %v1425_v61 = vmul.f32 0.0078125, %v1423_v39  ;;  %v2782_v38 = vld [vmem:[#allocation11 + $0x18] sm:$0xff]  }
 0x9cc   : > { %v2783_v39 = vld [vmem:[#allocation11 + $0x98] sm:$0xff]  }
 0x9cd   : > { %v3525_v41 = vsub.f32 %v3517_v29, %v1425_v61  ;;  %v1428_v42 = vmul.f32 %v3522_v40, %v3522_v40  ;;  %v2785_v61 = vld [vmem:[#allocation11 + $0xe0] sm:$0xff]  }
 0x9cf   : > { %1430 = vadd.xlane.f32.xlu0 %v1428_v42  ;;  %v1429_v43 = vmul.f32 %v3525_v41, %v3525_v41  ;;  %v2787_v42 = vld [vmem:[#allocation11 + $0xa0] sm:$0xff]  }
 0x9d3   : > { %1432 = vadd.xlane.f32.xlu0 %v1429_v43  ;;  %v2788_v43 = vld [vmem:[#allocation11 + $0x68] sm:$0xff]  }
 0xa5c   : > { %v1431_v9 = vpop.xlane.xlu0 %1430 }
 0xa5d   : > { %v1434_v10 = vmul.f32 0.0078125, %v1431_v9 }
 0xa5f   : > { %v1436_v11 = vadd.f32 1e-05, %v1434_v10 }
 0xa60   : > { %v1433_v12 = vpop.xlane.xlu0 %1432 }
 0xa61   : > { %2836 = vrsqrt.f32 %v1436_v11  ;;  %v1435_v13 = vmul.f32 0.0078125, %v1433_v12 }
 0xa63   : > { %v1437_v14 = vadd.f32 1e-05, %v1435_v13 }
 0xa65   : > { %2838 = vrsqrt.f32 %v1437_v14 }
 0xa6b   : > { %v2837_v15 = vpop.eup %2836 }
 0xa6c   : > { %v1440_v4 = vmul.f32 %v2837_v15, %v3522_v40  ;;  %v2784_v40 = vld [vmem:[#allocation11 + $0x60] sm:$0xff]  }
 0xa6e   : > { %v1448_v19 = vmul.f32 %v2337_v16, %v1440_v4 }
 0xa6f   : > { %v2839_v17 = vpop.eup %2838 }
 0xa70   : > { %v1441_v18 = vmul.f32 %v2839_v17, %v3525_v41  ;;  %v1456_v22 = vadd.f32 %v2338_v20, %v1448_v19  ;;  %v2786_v41 = vld [vmem:[#allocation11 + $0x20] sm:$0xff]  }
 0xa72   : > { %v1449_v21 = vmul.f32 %v2337_v16, %v1441_v18 }
 0xa74   : > { %v1457_v23 = vadd.f32 %v2338_v20, %v1449_v21 }
 0xa76   : > { %v1458_v27 = vpack.c.bf16 %v1457_v23, %v1456_v22 }
 0xa78   : > { %1706 = vmatmul.mubr.bf16.vlgmr.msra.gmra.mrb[28].mxu1 %v1458_v27  ;;  %1749 = vmatmul.mubr.bf16.vlgmr.msra.gmra.mrb[16].mxu0 %v1458_v27 }
 0xa79   : > { %2446 = vmatpush3.bf16.msra.mxu1 %v2770_v24  ;;  %2468 = vmatpush3.bf16.msra.mxu0 %v2771_v26 }
 0xa7a   : > { %2447 = vmatprep.subr.bf16.mxu1 %v2772_v28  ;;  %2469 = vmatprep.subr.bf16.mxu0 %v2773_v30 }
 0xa7d   : > { %2448 = vmatpush3.bf16.msra.mxu1 %v2774_v31  ;;  %2470 = vmatpush3.bf16.msra.mxu0 %v2775_v32 }
 0xa7e   : > { %2449 = vmatprep.subr.bf16.mxu1 %v2776_v33  ;;  %2471 = vmatprep.subr.bf16.mxu0 %v2777_v34 }
 0xa81   : > { %2450 = vmatpush3.bf16.msra.mxu1 %v2778_v35  ;;  %2472 = vmatpush3.bf16.msra.mxu0 %v2779_v0 }
 0xa82   : > { %2451 = vmatprep.subr.bf16.mxu1 %v2780_v36  ;;  %2473 = vmatprep.subr.bf16.mxu0 %v2781_v37 }
 0xa85   : > { %2452 = vmatpush3.bf16.msra.mxu1 %v2782_v38  ;;  %2474 = vmatpush3.bf16.msra.mxu0 %v2783_v39 }
 0xa86   : > { %2453 = vmatprep.subr.bf16.mxu1 %v2784_v40  ;;  %2475 = vmatprep.subr.bf16.mxu0 %v2785_v61 }
 0xa89   : > { %2454 = vmatpush3.bf16.msra.mxu1 %v2786_v41  ;;  %2476 = vmatpush3.bf16.msra.mxu0 %v2787_v42 }
 0xa8a   : > { %2455 = vmatprep.subr.bf16.mxu1 %v2788_v43  ;;  %2477 = vmatprep.subr.bf16.mxu0 %v2789_v44 }
 0xa8d   : > { %2456 = vmatpush3.bf16.msra.mxu1 %v2790_v45  ;;  %2478 = vmatpush3.bf16.msra.mxu0 %v2791_v46 }
 0xa8e   : > { %2457 = vmatprep.subr.bf16.mxu1 %v2792_v47  ;;  %2479 = vmatprep.subr.bf16.mxu0 %v2793_v48 }
 0xa91   : > { %2458 = vmatpush3.bf16.msra.mxu1 %v2794_v49  ;;  %2480 = vmatpush3.bf16.msra.mxu0 %v2795_v50 }
 0xa92   : > { %2459 = vmatprep.subr.bf16.mxu1 %v2796_v51  ;;  %2481 = vmatprep.subr.bf16.mxu0 %v2797_v52 }
 0xa95   : > { %2460 = vmatpush3.bf16.msra.mxu1 %v2798_v53  ;;  %2482 = vmatpush3.bf16.msra.mxu0 %v2799_v54 }
 0xb4b   : > { %v1707_v5 = vpop.f32.mrb[28].mxu1  ;;  %v1750_v6 = vpop.f32.mrb[16].mxu0 }
 0xb4c   : > { %v1708_v7 = vadd.f32 %v1707_v5, %v1496_v63  ;;  %v1751_v8 = vadd.f32 %v1750_v6, %v1504_v1  ;;  %v1709_v9 = vpop.f32.mrb[29].mxu1  ;;  %v1752_v10 = vpop.f32.mrb[17].mxu0  ;;  %v2371_v5 = vld [vmem:[%s3640_s3] ss:$0 sm:$0xff] }
 0xb4d   : > { %v1710_v11 = vadd.f32 %v1709_v9, %v1500_v2  ;;  %v1753_v12 = vadd.f32 %v1752_v10, %v1508_v3  ;;  %v1711_v13 = vpop.f32.mrb[30].mxu1  ;;  %v1754_v14 = vpop.f32.mrb[18].mxu0 }
 0xb4e   : > { %v1767_v15 = vmul.f32 0.70710677, %v1708_v7  ;;  %v1769_v4 = vmul.f32 0.70710677, %v1751_v8  ;;  %v1712_v18 = vadd.f32 %v1711_v13, %v1496_v63  ;;  %v1755_v19 = vadd.f32 %v1754_v14, %v1504_v1  ;;  %v1713_v20 = vpop.f32.mrb[31].mxu1  ;;  %v1756_v21 = vpop.f32.mrb[19].mxu0 }
 0xb4f   : > { %v1768_v16 = vmul.f32 0.70710677, %v1710_v11  ;;  %v1770_v17 = vmul.f32 0.70710677, %v1753_v12  ;;  %v1714_v22 = vadd.f32 %v1713_v20, %v1500_v2  ;;  %v1757_v23 = vadd.f32 %v1756_v21, %v1508_v3 }
 0xb50   : > { %2840 = verf.f32 %v1767_v15  ;;  %v1771_v24 = vmul.f32 0.70710677, %v1712_v18  ;;  %v1773_v26 = vmul.f32 0.70710677, %v1755_v19  ;;  %v1759_v0 = vmul.f32 0.5, %v1708_v7 }
 0xb51   : > { %2842 = verf.f32 %v1769_v4  ;;  %v1772_v27 = vmul.f32 0.70710677, %v1714_v22  ;;  %v1774_v28 = vmul.f32 0.70710677, %v1757_v23  ;;  %v1761_v36 = vmul.f32 0.5, %v1751_v8 }
 0xb52   : > { %2844 = verf.f32 %v1768_v16  ;;  %v1760_v39 = vmul.f32 0.5, %v1710_v11  ;;  %v1763_v61 = vmul.f32 0.5, %v1712_v18  ;;  %v1762_v43 = vmul.f32 0.5, %v1753_v12 }
 0xb53   : > { %2846 = verf.f32 %v1770_v17  ;;  %v1765_v45 = vmul.f32 0.5, %v1755_v19  ;;  %v1764_v50 = vmul.f32 0.5, %v1714_v22  ;;  %v1766_v54 = vmul.f32 0.5, %v1757_v23 }
 0xb54   : > { %2848 = verf.f32 %v1771_v24 }
 0xb55   : > { %2850 = verf.f32 %v1773_v26 }
 0xb56   : > { %2852 = verf.f32 %v1772_v27 }
 0xb57   : > { %2854 = verf.f32 %v1774_v28 }
 0xb5a   : > { %v2841_v30 = vpop.eup %2840 }
 0xb5b   : > { %v2843_v31 = vpop.eup %2842  ;;  %v1783_v34 = vadd.f32 1.0, %v2841_v30 }
 0xb5c   : > { %v2845_v32 = vpop.eup %2844  ;;  %v1785_v37 = vadd.f32 1.0, %v2843_v31 }
 0xb5d   : > { %v2847_v33 = vpop.eup %2846  ;;  %v1784_v40 = vadd.f32 1.0, %v2845_v32  ;;  %v1791_v48 = vmul.f32 %v1783_v34, %v1759_v0 }
 0xb5e   : > { %v2849_v35 = vpop.eup %2848  ;;  %v1786_v44 = vadd.f32 1.0, %v2847_v33  ;;  %v1793_v52 = vmul.f32 %v1785_v37, %v1761_v36 }
 0xb5f   : > { %v2851_v38 = vpop.eup %2850  ;;  %v1787_v41 = vadd.f32 1.0, %v2849_v35  ;;  %v1792_v56 = vmul.f32 %v1784_v40, %v1760_v39 }
 0xb60   : > { %v2853_v42 = vpop.eup %2852  ;;  %v1789_v46 = vadd.f32 1.0, %v2851_v38  ;;  %v1794_v59 = vmul.f32 %v1786_v44, %v1762_v43 }
 0xb61   : > { %v2855_v47 = vpop.eup %2854  ;;  %v1795_v49 = vmul.f32 %v1787_v41, %v1763_v61  ;;  %v1788_v51 = vadd.f32 1.0, %v2853_v42 }
 0xb62   : > { %v1797_v53 = vmul.f32 %v1789_v46, %v1765_v45  ;;  %v1790_v55 = vadd.f32 1.0, %v2855_v47 }
 0xb63   : > { %v1799_v57 = vpack.c.bf16 %v1795_v49, %v1791_v48  ;;  %v1796_v58 = vmul.f32 %v1788_v51, %v1764_v50 }
 0xb64   : > { %v1801_v60 = vpack.c.bf16 %v1797_v53, %v1793_v52  ;;  %v1798_v62 = vmul.f32 %v1790_v55, %v1766_v54 }
 0xb65   : > { %v1800_v63 = vpack.c.bf16 %v1796_v58, %v1792_v56 }
 0xb66   : > { %v1802_v1 = vpack.c.bf16 %v1798_v62, %v1794_v59 }
 0xb67   : > { %2098 = vmatprep.mubr.bf16.mxu1 %v1800_v63 }
 0xb68   : > { %2139 = vmatprep.mubr.bf16.mxu0 %v1802_v1  ;;  %2099 = vmatmul.mubr.bf16.vlgmr.msra.gmra.mrb[32].mxu1 %v1799_v57 }
 0xb69   : > { %2140 = vmatmul.mubr.bf16.vlgmr.msra.gmra.mrb[20].mxu0 %v1801_v60 }
 0xc3b   : > { %v2461_v2 = vpop.f32.mrb[32].mxu1 }
 0xc3c   : > { %v2483_v3 = vpop.f32.mrb[20].mxu0  ;;  %v2462_v6 = vpop.f32.mrb[33].mxu1 }
 0xc3d   : > { %v2463_v7 = vadd.f32 %v2462_v6, %v2461_v2  ;;  %v2484_v8 = vpop.f32.mrb[21].mxu0  ;;  %v2464_v9 = vpop.f32.mrb[34].mxu1 }
 0xc3e   : > { %v2485_v10 = vadd.f32 %v2484_v8, %v2483_v3  ;;  %v2486_v11 = vpop.f32.mrb[22].mxu0  ;;  %v2465_v12 = vpop.f32.mrb[35].mxu1 }
 0xc3f   : > { %v2101_v13 = vadd.f32 %v2463_v7, %v2371_v5  ;;  %v2466_v14 = vadd.f32 %v2465_v12, %v2464_v9  ;;  %v2487_v15 = vpop.f32.mrb[23].mxu0 }
 0xc40   : > { %v2488_v4 = vadd.f32 %v2487_v15, %v2486_v11 }
 0xc41   : > { %v2142_v16 = vadd.f32 %v2485_v10, %v2101_v13  ;;  %v2104_v17 = vadd.f32 %v2466_v14, %v2371_v5 }
 0xc43   : > { %v2148_v18 = vadd.f32 %v2142_v16, %v3514_v25  ;;  %v2145_v19 = vadd.f32 %v2488_v4, %v2104_v17 }
 0xc45   : > { %2150 = vst [vmem:[%s489_s18] sm:$0xff] %v2148_v18  ;;  %v2149_v20 = vadd.f32 %v2145_v19, %v3517_v29 }
 0xc47   : > { %2151 = vst [vmem:[%s489_s18 + $0x8] sm:$0xff] %v2149_v20 }
 0xc48   : > { %3012 = shalt.err (!%p3009_p13)
}
 0xc49   : > { %s3013_s16 = scalar_lea.hbm %s3554_s26, 256  ;;  %s3017_s18 = scalar_lea.hbm %s3641_s9, 512 }
 0xc4a   : > { %p3014_p9 = scmp.ne.s32.totalorder %s3554_s26, %s3013_s16  ;;  %p3018_p4 = scmp.lt.u32.totalorder %s3554_s26, %s3641_s9 }
 0xc4b   : > { %p3019_p8 = scmp.lt.u32.totalorder %s3017_s18, %s3013_s16  ;;  %p3021_p3 = scmp.lt.u32.totalorder %s3013_s16, %s3554_s26 }
 0xc4c   : > { %p3015_p0 = pnand %p3014_p9, %p3318_p10 }
 0xc4d   : > { %p3020_p6 = por %p3019_p8, %p3018_p4 }
 0xc4e   : > { %p3016_p11 = pneg %p3015_p0 }
 0xc4f   : > { %p3022_p5 = por %p3021_p3, %p3020_p6 }
 0xc51   : > { %p3023_p7 = pnand %p3022_p5, %p3016_p11 }
 0xc53   : > { %3026 = shalt.err (!%p3023_p7)
}
 0xc54   : > { %s3095_s14 = smov 128   ;;  %s3096_s27 = smov 8  }
 0xc55   : > { %2595 = dma.vmem_to_hbm [thread:$0]  (%p3318_p10), %s3549_s13, 256, %s3554_s26, %s2153_s11, %s3095_s14, %s3095_s14, %s3096_s27  }
 0xc56 PF: > { %s3642_s25 = sld [smem:[#allocation17_spill]]  ;;  %s3643_s29 = sld [smem:[#allocation18_spill]] }
 0xc57   : > { %p3645_p2 = scmp.ge.s32.totalorder %s3073_s24, 2 }
 0xc5c   : > { %s2181_s17 = sand.u32 1, %s3642_s25   ;;  %p3644_p12 = scmp.ne.s32.totalorder %s3643_s29, 0 }
 0xc5d   : > { %s2182_s16 = scalar_lea.sflag [#allocation5], %s2181_s17 }
 0xc5e   : > { %p2615_p1 = pnand %p3645_p2, %p3644_p12 }
 0xc60   : > { %3056 = dma.done.wait (!%p2615_p1), %s2182_s16, 256  }
 0xc61   : > { %3058 = vsyncadd (!%p2615_p1), %s2182_s16, 4294967040  ;;  %p27_p13 = scmp.ge.s32.totalorder %s3308_s30, 4   ;;  %s3646_s21 = smov %s3065_s22 }
 0xc62   : > { %s3647_s22 = smov %s3069_s23  ;;  %s3648_s23 = smov %s3324_s20 }
 0xc63   : > { %s3649_s24 = smov %s3308_s30  ;;  %29 = sbr.rel (!%p27_p13) target bundleno = 12 (0xc), region = 129 }
 0xc6a   :  { %2187 = vsyncpa [#allocation4], 1 }
 0xc6b   :  { %2189 = vsyncpa [#allocation4 + $0x1], 1 }
 0xc6c   :  { %2190 = vsyncpa [#allocation7], 1 }
 0xc6d   :  { %2191 = vsyncpa [#allocation10], 1 }
 0xc6e   :  { %2192 = vsyncpa [#allocation5], 1 }
 0xc6f   :  { %2194 = vsyncpa [#allocation5 + $0x1], 1 }

</bundles_post_ra>
